<compile_context>
chip_gen: v7x
topology: tpu7x:2x2x1
jax: 0.10.0
libtpu: 0.0.40
codegen_flags: <defaults>
</compile_context>

<pallas_src>
import functools

import jax
import jax.numpy as jnp
import numpy as np
from jax import lax
from jax.experimental import pallas as pl
from jax.experimental.pallas import tpu as pltpu


# ------------------------------- helpers --------------------------------------

def _round_up(a, b):
    return (a + b - 1) // b * b


def _bias_layout(d_model, hidden2, z2, z):
    """Row offsets / total rows of the concatenated column-vector bias buffer.

    Each segment is padded to a multiple of 8 rows so every in-kernel slice
    start stays sublane-aligned.
    """
    sizes = (d_model, hidden2, z2, z)
    padded = tuple(_round_up(s, 8) for s in sizes)
    offs = (0,
            padded[0],
            padded[0] + padded[1],
            padded[0] + padded[1] + padded[2])
    return offs, sum(padded)


def _choose_tile(m_tokens, tm_target):
    """Token tile (lane axis of the feature-major intermediates): multiple of 128."""
    m128 = _round_up(max(m_tokens, 1), 128)
    tm = min(_round_up(max(tm_target, 128), 128), m128)
    # Keep >= 2 grid tiles when the token count allows it so v7x's two
    # TensorCores (dimension_semantics=("parallel",)) both get work.
    if m128 >= 256 and tm > m128 // 2:
        tm = max(128, (m128 // 2) // 128 * 128)
    return tm


def _vmem_limit_bytes(frac=0.75):
    """Generation-aware scoped-VMEM cap (v7x: 64 MiB/TC, v5e/v6e: 128 MiB)."""
    try:
        cap = int(pltpu.get_tpu_info().vmem_capacity_bytes)
    except Exception:
        cap = 64 * 1024 * 1024
    return max(32 * 1024 * 1024, int(cap * frac))


# ----------------------------- in-kernel math ----------------------------------

def _recip(x):
    # EUP approximate reciprocal + one Newton step (~1e-7 rel. error): keeps the
    # divide off the VALU on the widest elementwise stage (the GELU erf).
    r = pl.reciprocal(x, approx=True)
    return r * (2.0 - x * r)


def _erf(x):
    # Abramowitz & Stegun 7.1.26 rational approximation (|err| < 1.5e-7).
    p = 0.3275911
    a1, a2, a3, a4, a5 = (0.254829592, -0.284496736, 1.421413741,
                          -1.453152027, 1.061405429)
    s = jnp.where(x >= 0.0, 1.0, -1.0)
    ax = jnp.abs(x)
    t = _recip(1.0 + p * ax)
    poly = ((((a5 * t + a4) * t + a3) * t + a2) * t + a1) * t
    return s * (1.0 - poly * jnp.exp(-ax * ax))


def _gelu_exact(x):
    # PyTorch nn.GELU() default: 0.5 * x * (1 + erf(x / sqrt(2)))
    return 0.5 * x * (1.0 + _erf(x * 0.7071067811865476))


def _sigmoid(x):
    # inf-safe (exp overflow -> denominator inf -> output 0), exact divide.
    return 1.0 / (1.0 + jnp.exp(-x))


def _softplus(x):
    # PyTorch F.softplus(beta=1, threshold=20): identity above the threshold.
    return jnp.where(x > 20.0, x, jnp.log(1.0 + jnp.exp(jnp.minimum(x, 20.0))))


# --------------------------------- kernel --------------------------------------

def vae_kernel(x_ref, w1_ref, wa_ref, wb_ref, we_ref, b_ref, o_ref,
               *, dims, bias_offs):
    """x_ref: (tm, D) token-major tile.  o_ref: (tm, Z) token-major tile.

    All intermediates are kept feature-major (features on sublanes, tokens on
    the 128-wide lane axis) so sigmoid/GELU/softplus run on fully packed vregs.
    The first matmul contracts on dim 1 of both operands (no explicit transpose
    of x needed); only the small (Z, tm) result is transposed back (XLU) for
    the token-major store.
    """
    D, H2, Z2, Z = dims                       # d_model, 2*hidden, 2*z, z
    ob1, oba, obb, obe = bias_offs

    # Column-vector biases (feat, 1) broadcast along the lane (token) axis.
    b1 = b_ref[ob1:ob1 + D, :]
    ba = b_ref[oba:oba + H2, :]
    bb = b_ref[obb:obb + Z2, :]
    be = b_ref[obe:obe + Z, :]

    wdt = wa_ref.dtype                        # matmul operand dtype (f32 / bf16)

    # self.linear: Linear(d_model, d_model) + Sigmoid, computed feature-major:
    #   h = (x @ W1)^T = W1^T "NT-matmul" x   (contract dim 1 of both operands)
    x = x_ref[...]
    h = _sigmoid(
        lax.dot_general(w1_ref[...], x.astype(wdt),
                        (((1,), (1,)), ((), ())),
                        preferred_element_type=jnp.float32) + b1)        # (D, tm)

    # fused prior_encoder_{mu,std} first Linear + GELU
    h1 = _gelu_exact(
        jnp.dot(wa_ref[...], h.astype(wdt),
                preferred_element_type=jnp.float32) + ba)                # (2H, tm)

    # fused prior_encoder_{mu,std} second Linear + Softplus -> [mu ; sd]
    z2 = _softplus(
        jnp.dot(wb_ref[...], h1.astype(wdt),
                preferred_element_type=jnp.float32) + bb)                # (2Z, tm)

    # self.emd: Linear(2z, z) + Softplus on concat([mu, sd]) (already stacked)
    out = _softplus(
        jnp.dot(we_ref[...], z2.astype(wdt),
                preferred_element_type=jnp.float32) + be)                # (Z, tm)

    # Back to token-major for the store; the transpose rides the idle XLU slot.
    o_ref[...] = jnp.transpose(out).astype(o_ref.dtype)                  # (tm, Z)


# -------------------------------- wrapper ---------------------------------------

def _build_call(kernel, m_arr, d_model, z_size, tm, param_arrays, single_buffer):
    if single_buffer:
        def wspec(a):
            return pl.BlockSpec(a.shape, lambda i: (0, 0),
                                pipeline_mode=pl.Buffered(buffer_count=1))
    else:
        def wspec(a):
            return pl.BlockSpec(a.shape, lambda i: (0, 0))

    return pl.pallas_call(
        kernel,
        out_shape=jax.ShapeDtypeStruct((m_arr, z_size), jnp.float32),
        grid=(pl.cdiv(m_arr, tm),),
        in_specs=[pl.BlockSpec((tm, d_model), lambda i: (i, 0))]
                 + [wspec(a) for a in param_arrays],
        out_specs=pl.BlockSpec((tm, z_size), lambda i: (i, 0)),
        compiler_params=pltpu.CompilerParams(
            dimension_semantics=("parallel",),
            vmem_limit_bytes=_vmem_limit_bytes()),
    )


def vae_forward(x, fused, *, tm=2048, matmul_dtype=jnp.float32,
                single_buffer_weights=True):
    """x: (B, S, d_model) -> (B, S, z_size) f32.

    `fused` comes from fuse_params().  matmul_dtype=jnp.bfloat16 casts only the
    dot operands (resident weights host-side, streamed activations in-kernel)
    and is valid on every TPU generation; nonlinearities/accumulation stay f32.
    """
    B, S, D_in = x.shape
    M = B * S

    w1T = fused["w1T"].astype(matmul_dtype)      # (D, D)    = W1^T
    waT = fused["waT"].astype(matmul_dtype)      # (2H, D)   = [Wmu1|Wsd1]^T
    wbT = fused["wbT"].astype(matmul_dtype)      # (2Z, 2H)  = blockdiag(Wmu2,Wsd2)^T
    weT = fused["weT"].astype(matmul_dtype)      # (Z, 2Z)   = We^T
    bias = fused["bias"]                         # (total, 1) f32

    D, H2, Z2, Z = w1T.shape[0], waT.shape[0], wbT.shape[0], weT.shape[0]
    if D != D_in:
        raise ValueError("d_model mismatch between x and params")
    bias_offs, bias_total = _bias_layout(D, H2, Z2, Z)
    if bias.shape[0] != bias_total:
        raise ValueError("bias buffer layout mismatch")

    # x stays token-major and uncast: it is read exactly once, inside the kernel.
    xw = x.reshape(M, D)
    M_arr = M
    if M < 128:
        # Sub-tile input: pad to one full 128-token tile (a few KiB at most).
        # For M >= 128 no pad copy is made; the ragged last block is handled by
        # the cdiv grid (garbage OOB rows never mix into valid token columns).
        M_arr = 128
        xw = jnp.pad(xw, ((0, M_arr - M), (0, 0)))

    tm = _choose_tile(M_arr, tm)

    kernel = functools.partial(vae_kernel, dims=(D, H2, Z2, Z),
                               bias_offs=bias_offs)
    params = (w1T, waT, wbT, weT, bias)

    def run(single_buffer):
        call = _build_call(kernel, M_arr, D, Z, tm, params, single_buffer)
        return call(xw, *params)

    if single_buffer_weights:
        try:
            out = run(True)
        except Exception:
            # pl.Buffered(1) on grid-invariant inputs not accepted by this jax
            # version -> fall back to default double buffering (identical
            # results; only costs a little extra VMEM residency).
            out = run(False)
    else:
        out = run(False)

    if M_arr != M:
        out = out[:M]
    return out.reshape(B, S, Z)


# --------------------------- deterministic params -------------------------------

def make_params(key, d_model, hidden_size, z_size):
    """Per-layer weights as (in, out); biases as (1, out) -- PyTorch-style init."""
    ks = jax.random.split(key, 6)

    def lin(k, fan_in, fan_out):
        kw, kb = jax.random.split(k)
        bound = 1.0 / np.sqrt(fan_in)
        w = jax.random.uniform(kw, (fan_in, fan_out), jnp.float32, -bound, bound)
        b = jax.random.uniform(kb, (1, fan_out), jnp.float32, -bound, bound)
        return w, b

    w1, b1 = lin(ks[0], d_model, d_model)
    wmu1, bmu1 = lin(ks[1], d_model, hidden_size)
    wmu2, bmu2 = lin(ks[2], hidden_size, z_size)
    wsd1, bsd1 = lin(ks[3], d_model, hidden_size)
    wsd2, bsd2 = lin(ks[4], hidden_size, z_size)
    we, be = lin(ks[5], 2 * z_size, z_size)

    return dict(w1=w1, b1=b1,
                wmu1=wmu1, bmu1=bmu1, wmu2=wmu2, bmu2=bmu2,
                wsd1=wsd1, bsd1=bsd1, wsd2=wsd2, bsd2=bsd2,
                we=we, be=be)


def fuse_params(p):
    """Fused, (out_features, in_features)-layout parameter set for the kernel."""
    D = p["w1"].shape[0]
    H = p["wmu1"].shape[1]
    Z = p["wmu2"].shape[1]

    # [Wmu1 | Wsd1] : (D, 2H)
    wa = jnp.concatenate([p["wmu1"], p["wsd1"]], axis=1)
    # blockdiag(Wmu2, Wsd2) : (2H, 2Z) -> h1 @ Wb = [mu_pre | sd_pre]
    wb = jnp.zeros((2 * H, 2 * Z), jnp.float32)
    wb = wb.at[:H, :Z].set(p["wmu2"]).at[H:, Z:].set(p["wsd2"])
    ba = jnp.concatenate([p["bmu1"], p["bsd1"]], axis=1)        # (1, 2H)
    bb = jnp.concatenate([p["bmu2"], p["bsd2"]], axis=1)        # (1, 2Z)

    # (out, in) weights for the feature-major pipeline.
    w1T, waT, wbT, weT = p["w1"].T, wa.T, wb.T, p["we"].T

    # One concatenated column-vector bias buffer (segments 8-row aligned).
    offs, total = _bias_layout(D, 2 * H, 2 * Z, Z)
    bias = jnp.zeros((total, 1), jnp.float32)
    for seg, off in zip((p["b1"].T, ba.T, bb.T, p["be"].T), offs):
        bias = bias.at[off:off + seg.shape[0], :].set(seg)

    return dict(w1T=w1T, waT=waT, wbT=wbT, weT=weT, bias=bias)


# ------------------------------ plain-JAX reference ------------------------------

def vae_reference(x, p):
    h = jax.nn.sigmoid(x @ p["w1"] + p["b1"])
    mu = jax.nn.softplus(jax.nn.gelu(h @ p["wmu1"] + p["bmu1"],
                                     approximate=False) @ p["wmu2"] + p["bmu2"])
    sd = jax.nn.softplus(jax.nn.gelu(h @ p["wsd1"] + p["bsd1"],
                                     approximate=False) @ p["wsd2"] + p["bsd2"])
    zcat = jnp.concatenate([mu, sd], axis=-1)
    return jax.nn.softplus(zcat @ p["we"] + p["be"])


# ---------------------------------- main ------------------------------------------

if __name__ == "__main__":
    d_model, hidden_size, z_size = 32, 32, 16

    key = jax.random.PRNGKey(0)
    kx, kp, kx2 = jax.random.split(key, 3)

    base_params = make_params(kp, d_model, hidden_size, z_size)
    fused_params = fuse_params(base_params)

    # Small shape from the module spec: (batch=2, seq=8, d_model=32).
    x = jax.random.normal(kx, (2, 8, d_model), jnp.float32)
    ref = vae_reference(x, base_params)

    out = vae_forward(x, fused_params)                       # f32 dot operands
    jax.block_until_ready(out)
    np.testing.assert_allclose(np.asarray(out), np.asarray(ref),
                               rtol=2e-3, atol=2e-3)

    # bf16 dot operands (valid on v5e/v6e/v7x): looser tolerance.
    out_bf16 = vae_forward(x, fused_params, matmul_dtype=jnp.bfloat16)
    jax.block_until_ready(out_bf16)
    np.testing.assert_allclose(np.asarray(out_bf16), np.asarray(ref),
                               rtol=3e-2, atol=3e-2)

    # Ragged multi-tile path: M = 3*50 = 150 tokens -> tm=128, grid=2 with a
    # partial last block (exercises the no-pad cdiv grid + 2-tile megacore split).
    x2 = jax.random.normal(kx2, (3, 50, d_model), jnp.float32)
    out2 = vae_forward(x2, fused_params)
    jax.block_until_ready(out2)
    np.testing.assert_allclose(np.asarray(out2),
                               np.asarray(vae_reference(x2, base_params)),
                               rtol=2e-3, atol=2e-3)

    print("KERNEL_OK")
</pallas_src>

<mosaic_0001>
module attributes {stable_mosaic.version = 11 : i64} {
  func.func @vae_kernel(%arg0: i32, %arg1: memref<128x32xf32, #tpu.memory_space<vmem>>, %arg2: memref<32x32xf32, #tpu.memory_space<vmem>>, %arg3: memref<64x32xf32, #tpu.memory_space<vmem>>, %arg4: memref<32x64xf32, #tpu.memory_space<vmem>>, %arg5: memref<16x32xf32, #tpu.memory_space<vmem>>, %arg6: memref<144x1xf32, #tpu.memory_space<vmem>>, %arg7: memref<128x16xf32, #tpu.memory_space<vmem>>) attributes {dimension_semantics = [#tpu.dimension_semantics<parallel>], iteration_bounds = array<i64: 1>, scalar_prefetch = 0 : i64, scratch_operands = 0 : i64, tpu.core_type = #tpu.core_type<tc>, window_params = [{transform_indices = @transform_0, window_bounds = array<i64: 128, 32>}, {pipeline_mode = #tpu.pipeline_mode<synchronous>, transform_indices = @transform_1, window_bounds = array<i64: 32, 32>}, {pipeline_mode = #tpu.pipeline_mode<synchronous>, transform_indices = @transform_2, window_bounds = array<i64: 64, 32>}, {pipeline_mode = #tpu.pipeline_mode<synchronous>, transform_indices = @transform_3, window_bounds = array<i64: 32, 64>}, {pipeline_mode = #tpu.pipeline_mode<synchronous>, transform_indices = @transform_4, window_bounds = array<i64: 16, 32>}, {pipeline_mode = #tpu.pipeline_mode<synchronous>, transform_indices = @transform_5, window_bounds = array<i64: 144, 1>}, {transform_indices = @transform_6, window_bounds = array<i64: 128, 16>}]} {
    %c0 = arith.constant 0 : index
    %c0_0 = arith.constant 0 : index
    %0 = vector.load %arg6[%c0, %c0_0] : memref<144x1xf32, #tpu.memory_space<vmem>>, vector<32x1xf32>
    %c32 = arith.constant 32 : index
    %c0_1 = arith.constant 0 : index
    %1 = vector.load %arg6[%c32, %c0_1] : memref<144x1xf32, #tpu.memory_space<vmem>>, vector<64x1xf32>
    %c96 = arith.constant 96 : index
    %c0_2 = arith.constant 0 : index
    %2 = vector.load %arg6[%c96, %c0_2] : memref<144x1xf32, #tpu.memory_space<vmem>>, vector<32x1xf32>
    %c128 = arith.constant 128 : index
    %c0_3 = arith.constant 0 : index
    %3 = vector.load %arg6[%c128, %c0_3] : memref<144x1xf32, #tpu.memory_space<vmem>>, vector<16x1xf32>
    %c0_4 = arith.constant 0 : index
    %c0_5 = arith.constant 0 : index
    %4 = vector.load %arg1[%c0_4, %c0_5] : memref<128x32xf32, #tpu.memory_space<vmem>>, vector<128x32xf32>
    %c0_6 = arith.constant 0 : index
    %c0_7 = arith.constant 0 : index
    %5 = vector.load %arg2[%c0_6, %c0_7] : memref<32x32xf32, #tpu.memory_space<vmem>>, vector<32x32xf32>
    %cst = arith.constant dense<0.000000e+00> : vector<32x128xf32>
    %6 = tpu.matmul %5, %4, %cst {dimension_numbers = #tpu.dot_dimension_numbers<[1], [1], [0], [0], [0, 0, 1, 0], [], []>} : vector<32x32xf32>, vector<128x32xf32>, vector<32x128xf32> -> vector<32x128xf32>
    %7 = vector.broadcast %0 : vector<32x1xf32> to vector<32x128xf32>
    %8 = arith.addf %6, %7 : vector<32x128xf32>
    %cst_8 = arith.constant 0.000000e+00 : f32
    %9 = vector.broadcast %cst_8 : f32 to vector<32x128xf32>
    %10 = arith.subf %9, %8 : vector<32x128xf32>
    %11 = math.exp %10 : vector<32x128xf32>
    %cst_9 = arith.constant 1.000000e+00 : f32
    %12 = vector.broadcast %cst_9 : f32 to vector<32x128xf32>
    %13 = arith.addf %12, %11 : vector<32x128xf32>
    %cst_10 = arith.constant 1.000000e+00 : f32
    %14 = vector.broadcast %cst_10 : f32 to vector<32x128xf32>
    %15 = arith.divf %14, %13 : vector<32x128xf32>
    %c0_11 = arith.constant 0 : index
    %c0_12 = arith.constant 0 : index
    %16 = vector.load %arg3[%c0_11, %c0_12] : memref<64x32xf32, #tpu.memory_space<vmem>>, vector<64x32xf32>
    %cst_13 = arith.constant dense<0.000000e+00> : vector<64x128xf32>
    %17 = tpu.matmul %16, %15, %cst_13 {dimension_numbers = #tpu.dot_dimension_numbers<[1], [0], [0], [1], [0, 0, 1, 1], [], []>} : vector<64x32xf32>, vector<32x128xf32>, vector<64x128xf32> -> vector<64x128xf32>
    %18 = vector.broadcast %1 : vector<64x1xf32> to vector<64x128xf32>
    %19 = arith.addf %17, %18 : vector<64x128xf32>
    %cst_14 = arith.constant 5.000000e-01 : f32
    %20 = vector.broadcast %cst_14 : f32 to vector<64x128xf32>
    %21 = arith.mulf %20, %19 : vector<64x128xf32>
    %cst_15 = arith.constant 0.707106769 : f32
    %22 = vector.broadcast %cst_15 : f32 to vector<64x128xf32>
    %23 = arith.mulf %19, %22 : vector<64x128xf32>
    %cst_16 = arith.constant 0.000000e+00 : f32
    %24 = vector.broadcast %cst_16 : f32 to vector<64x128xf32>
    %25 = arith.cmpf oge, %23, %24 : vector<64x128xf32>
    %cst_17 = arith.constant 1.000000e+00 : f32
    %cst_18 = arith.constant -1.000000e+00 : f32
    %26 = vector.broadcast %cst_17 : f32 to vector<64x128xf32>
    %27 = vector.broadcast %cst_18 : f32 to vector<64x128xf32>
    %28 = arith.select %25, %26, %27 : vector<64x128xi1>, vector<64x128xf32>
    %29 = math.absf %23 : vector<64x128xf32>
    %cst_19 = arith.constant 0.327591091 : f32
    %30 = vector.broadcast %cst_19 : f32 to vector<64x128xf32>
    %31 = arith.mulf %30, %29 : vector<64x128xf32>
    %cst_20 = arith.constant 1.000000e+00 : f32
    %32 = vector.broadcast %cst_20 : f32 to vector<64x128xf32>
    %33 = arith.addf %32, %31 : vector<64x128xf32>
    %34 = tpu.reciprocal %33 {approx = true} : vector<64x128xf32> -> vector<64x128xf32>
    %35 = arith.mulf %33, %34 : vector<64x128xf32>
    %cst_21 = arith.constant 2.000000e+00 : f32
    %36 = vector.broadcast %cst_21 : f32 to vector<64x128xf32>
    %37 = arith.subf %36, %35 : vector<64x128xf32>
    %38 = arith.mulf %34, %37 : vector<64x128xf32>
    %cst_22 = arith.constant 1.06140542 : f32
    %39 = vector.broadcast %cst_22 : f32 to vector<64x128xf32>
    %40 = arith.mulf %39, %38 : vector<64x128xf32>
    %cst_23 = arith.constant -1.45315206 : f32
    %41 = vector.broadcast %cst_23 : f32 to vector<64x128xf32>
    %42 = arith.addf %40, %41 : vector<64x128xf32>
    %43 = arith.mulf %42, %38 : vector<64x128xf32>
    %cst_24 = arith.constant 1.42141378 : f32
    %44 = vector.broadcast %cst_24 : f32 to vector<64x128xf32>
    %45 = arith.addf %43, %44 : vector<64x128xf32>
    %46 = arith.mulf %45, %38 : vector<64x128xf32>
    %cst_25 = arith.constant -0.284496725 : f32
    %47 = vector.broadcast %cst_25 : f32 to vector<64x128xf32>
    %48 = arith.addf %46, %47 : vector<64x128xf32>
    %49 = arith.mulf %48, %38 : vector<64x128xf32>
    %cst_26 = arith.constant 0.254829586 : f32
    %50 = vector.broadcast %cst_26 : f32 to vector<64x128xf32>
    %51 = arith.addf %49, %50 : vector<64x128xf32>
    %52 = arith.mulf %51, %38 : vector<64x128xf32>
    %cst_27 = arith.constant 0.000000e+00 : f32
    %53 = vector.broadcast %cst_27 : f32 to vector<64x128xf32>
    %54 = arith.subf %53, %29 : vector<64x128xf32>
    %55 = arith.mulf %54, %29 : vector<64x128xf32>
    %56 = math.exp %55 : vector<64x128xf32>
    %57 = arith.mulf %52, %56 : vector<64x128xf32>
    %cst_28 = arith.constant 1.000000e+00 : f32
    %58 = vector.broadcast %cst_28 : f32 to vector<64x128xf32>
    %59 = arith.subf %58, %57 : vector<64x128xf32>
    %60 = arith.mulf %28, %59 : vector<64x128xf32>
    %cst_29 = arith.constant 1.000000e+00 : f32
    %61 = vector.broadcast %cst_29 : f32 to vector<64x128xf32>
    %62 = arith.addf %61, %60 : vector<64x128xf32>
    %63 = arith.mulf %21, %62 : vector<64x128xf32>
    %c0_30 = arith.constant 0 : index
    %c0_31 = arith.constant 0 : index
    %64 = vector.load %arg4[%c0_30, %c0_31] : memref<32x64xf32, #tpu.memory_space<vmem>>, vector<32x64xf32>
    %cst_32 = arith.constant dense<0.000000e+00> : vector<32x128xf32>
    %65 = tpu.matmul %64, %63, %cst_32 {dimension_numbers = #tpu.dot_dimension_numbers<[1], [0], [0], [1], [0, 0, 1, 1], [], []>} : vector<32x64xf32>, vector<64x128xf32>, vector<32x128xf32> -> vector<32x128xf32>
    %66 = vector.broadcast %2 : vector<32x1xf32> to vector<32x128xf32>
    %67 = arith.addf %65, %66 : vector<32x128xf32>
    %cst_33 = arith.constant 2.000000e+01 : f32
    %68 = vector.broadcast %cst_33 : f32 to vector<32x128xf32>
    %69 = arith.cmpf ogt, %67, %68 : vector<32x128xf32>
    %cst_34 = arith.constant 2.000000e+01 : f32
    %70 = vector.broadcast %cst_34 : f32 to vector<32x128xf32>
    %71 = arith.minimumf %67, %70 : vector<32x128xf32>
    %72 = math.exp %71 : vector<32x128xf32>
    %cst_35 = arith.constant 1.000000e+00 : f32
    %73 = vector.broadcast %cst_35 : f32 to vector<32x128xf32>
    %74 = arith.addf %73, %72 : vector<32x128xf32>
    %75 = math.log %74 : vector<32x128xf32>
    %76 = arith.select %69, %67, %75 : vector<32x128xi1>, vector<32x128xf32>
    %c0_36 = arith.constant 0 : index
    %c0_37 = arith.constant 0 : index
    %77 = vector.load %arg5[%c0_36, %c0_37] : memref<16x32xf32, #tpu.memory_space<vmem>>, vector<16x32xf32>
    %cst_38 = arith.constant dense<0.000000e+00> : vector<16x128xf32>
    %78 = tpu.matmul %77, %76, %cst_38 {dimension_numbers = #tpu.dot_dimension_numbers<[1], [0], [0], [1], [0, 0, 1, 1], [], []>} : vector<16x32xf32>, vector<32x128xf32>, vector<16x128xf32> -> vector<16x128xf32>
    %79 = vector.broadcast %3 : vector<16x1xf32> to vector<16x128xf32>
    %80 = arith.addf %78, %79 : vector<16x128xf32>
    %cst_39 = arith.constant 2.000000e+01 : f32
    %81 = vector.broadcast %cst_39 : f32 to vector<16x128xf32>
    %82 = arith.cmpf ogt, %80, %81 : vector<16x128xf32>
    %cst_40 = arith.constant 2.000000e+01 : f32
    %83 = vector.broadcast %cst_40 : f32 to vector<16x128xf32>
    %84 = arith.minimumf %80, %83 : vector<16x128xf32>
    %85 = math.exp %84 : vector<16x128xf32>
    %cst_41 = arith.constant 1.000000e+00 : f32
    %86 = vector.broadcast %cst_41 : f32 to vector<16x128xf32>
    %87 = arith.addf %86, %85 : vector<16x128xf32>
    %88 = math.log %87 : vector<16x128xf32>
    %89 = arith.select %82, %80, %88 : vector<16x128xi1>, vector<16x128xf32>
    %90 = tpu.transpose %89, [1, 0] : vector<16x128xf32> -> vector<128x16xf32>
    %c0_42 = arith.constant 0 : index
    %c0_43 = arith.constant 0 : index
    %91 = vector.load %arg7[%c0_42, %c0_43] : memref<128x16xf32, #tpu.memory_space<vmem>>, vector<128x16xf32>
    tpu.vector_store %arg7[%c0_42, %c0_43], %90 {strides = array<i32>} : memref<128x16xf32, #tpu.memory_space<vmem>>, vector<128x16xf32>,
    return
  }
  func.func @transform_0(%arg0: i32) -> (i32, i32) {
    %c0_i32 = arith.constant 0 : i32
    %c0_i32_0 = arith.constant 0 : i32
    return %arg0, %c0_i32 : i32, i32
  }
  func.func @transform_1(%arg0: i32) -> (i32, i32) {
    %c0_i32 = arith.constant 0 : i32
    %c0_i32_0 = arith.constant 0 : i32
    %c0_i32_1 = arith.constant 0 : i32
    return %c0_i32, %c0_i32_0 : i32, i32
  }
  func.func @transform_2(%arg0: i32) -> (i32, i32) {
    %c0_i32 = arith.constant 0 : i32
    %c0_i32_0 = arith.constant 0 : i32
    %c0_i32_1 = arith.constant 0 : i32
    return %c0_i32, %c0_i32_0 : i32, i32
  }
  func.func @transform_3(%arg0: i32) -> (i32, i32) {
    %c0_i32 = arith.constant 0 : i32
    %c0_i32_0 = arith.constant 0 : i32
    %c0_i32_1 = arith.constant 0 : i32
    return %c0_i32, %c0_i32_0 : i32, i32
  }
  func.func @transform_4(%arg0: i32) -> (i32, i32) {
    %c0_i32 = arith.constant 0 : i32
    %c0_i32_0 = arith.constant 0 : i32
    %c0_i32_1 = arith.constant 0 : i32
    return %c0_i32, %c0_i32_0 : i32, i32
  }
  func.func @transform_5(%arg0: i32) -> (i32, i32) {
    %c0_i32 = arith.constant 0 : i32
    %c0_i32_0 = arith.constant 0 : i32
    %c0_i32_1 = arith.constant 0 : i32
    return %c0_i32, %c0_i32_0 : i32, i32
  }
  func.func @transform_6(%arg0: i32) -> (i32, i32) {
    %c0_i32 = arith.constant 0 : i32
    %c0_i32_0 = arith.constant 0 : i32
    return %arg0, %c0_i32 : i32, i32
  }
}

module attributes {stable_mosaic.version = 11 : i64} {
  func.func @vae_kernel(%arg0: i32, %arg1: memref<128x32xf32, #tpu.memory_space<vmem>>, %arg2: memref<32x32xf32, #tpu.memory_space<vmem>>, %arg3: memref<64x32xf32, #tpu.memory_space<vmem>>, %arg4: memref<32x64xf32, #tpu.memory_space<vmem>>, %arg5: memref<16x32xf32, #tpu.memory_space<vmem>>, %arg6: memref<144x1xf32, #tpu.memory_space<vmem>>, %arg7: memref<128x16xf32, #tpu.memory_space<vmem>>) attributes {dimension_semantics = [#tpu.dimension_semantics<parallel>], iteration_bounds = array<i64: 1>, scalar_prefetch = 0 : i64, scratch_operands = 0 : i64, tpu.core_type = #tpu.core_type<tc>, window_params = [{transform_indices = @transform_0, window_bounds = array<i64: 128, 32>}, {pipeline_mode = #tpu.pipeline_mode<synchronous>, transform_indices = @transform_1, window_bounds = array<i64: 32, 32>}, {pipeline_mode = #tpu.pipeline_mode<synchronous>, transform_indices = @transform_2, window_bounds = array<i64: 64, 32>}, {pipeline_mode = #tpu.pipeline_mode<synchronous>, transform_indices = @transform_3, window_bounds = array<i64: 32, 64>}, {pipeline_mode = #tpu.pipeline_mode<synchronous>, transform_indices = @transform_4, window_bounds = array<i64: 16, 32>}, {pipeline_mode = #tpu.pipeline_mode<synchronous>, transform_indices = @transform_5, window_bounds = array<i64: 144, 1>}, {transform_indices = @transform_6, window_bounds = array<i64: 128, 16>}]} {
    %c0 = arith.constant 0 : index
    %c0_0 = arith.constant 0 : index
    %0 = vector.load %arg6[%c0, %c0_0] : memref<144x1xf32, #tpu.memory_space<vmem>>, vector<32x1xf32>
    %c32 = arith.constant 32 : index
    %c0_1 = arith.constant 0 : index
    %1 = vector.load %arg6[%c32, %c0_1] : memref<144x1xf32, #tpu.memory_space<vmem>>, vector<64x1xf32>
    %c96 = arith.constant 96 : index
    %c0_2 = arith.constant 0 : index
    %2 = vector.load %arg6[%c96, %c0_2] : memref<144x1xf32, #tpu.memory_space<vmem>>, vector<32x1xf32>
    %c128 = arith.constant 128 : index
    %c0_3 = arith.constant 0 : index
    %3 = vector.load %arg6[%c128, %c0_3] : memref<144x1xf32, #tpu.memory_space<vmem>>, vector<16x1xf32>
    %c0_4 = arith.constant 0 : index
    %c0_5 = arith.constant 0 : index
    %4 = vector.load %arg1[%c0_4, %c0_5] : memref<128x32xf32, #tpu.memory_space<vmem>>, vector<128x32xf32>
    %c0_6 = arith.constant 0 : index
    %c0_7 = arith.constant 0 : index
    %5 = vector.load %arg2[%c0_6, %c0_7] : memref<32x32xf32, #tpu.memory_space<vmem>>, vector<32x32xf32>
    %cst = arith.constant dense<0.000000e+00> : vector<32x128xf32>
    %6 = tpu.matmul %5, %4, %cst {dimension_numbers = #tpu.dot_dimension_numbers<[1], [1], [0], [0], [0, 0, 1, 0], [], []>} : vector<32x32xf32>, vector<128x32xf32>, vector<32x128xf32> -> vector<32x128xf32>
    %7 = vector.broadcast %0 : vector<32x1xf32> to vector<32x128xf32>
    %8 = arith.addf %6, %7 : vector<32x128xf32>
    %cst_8 = arith.constant 0.000000e+00 : f32
    %9 = vector.broadcast %cst_8 : f32 to vector<32x128xf32>
    %10 = arith.subf %9, %8 : vector<32x128xf32>
    %11 = math.exp %10 : vector<32x128xf32>
    %cst_9 = arith.constant 1.000000e+00 : f32
    %12 = vector.broadcast %cst_9 : f32 to vector<32x128xf32>
    %13 = arith.addf %12, %11 : vector<32x128xf32>
    %cst_10 = arith.constant 1.000000e+00 : f32
    %14 = vector.broadcast %cst_10 : f32 to vector<32x128xf32>
    %15 = arith.divf %14, %13 : vector<32x128xf32>
    %c0_11 = arith.constant 0 : index
    %c0_12 = arith.constant 0 : index
    %16 = vector.load %arg3[%c0_11, %c0_12] : memref<64x32xf32, #tpu.memory_space<vmem>>, vector<64x32xf32>
    %cst_13 = arith.constant dense<0.000000e+00> : vector<64x128xf32>
    %17 = tpu.matmul %16, %15, %cst_13 {dimension_numbers = #tpu.dot_dimension_numbers<[1], [0], [0], [1], [0, 0, 1, 1], [], []>} : vector<64x32xf32>, vector<32x128xf32>, vector<64x128xf32> -> vector<64x128xf32>
    %18 = vector.broadcast %1 : vector<64x1xf32> to vector<64x128xf32>
    %19 = arith.addf %17, %18 : vector<64x128xf32>
    %cst_14 = arith.constant 5.000000e-01 : f32
    %20 = vector.broadcast %cst_14 : f32 to vector<64x128xf32>
    %21 = arith.mulf %20, %19 : vector<64x128xf32>
    %cst_15 = arith.constant 0.707106769 : f32
    %22 = vector.broadcast %cst_15 : f32 to vector<64x128xf32>
    %23 = arith.mulf %19, %22 : vector<64x128xf32>
    %cst_16 = arith.constant 0.000000e+00 : f32
    %24 = vector.broadcast %cst_16 : f32 to vector<64x128xf32>
    %25 = arith.cmpf oge, %23, %24 : vector<64x128xf32>
    %cst_17 = arith.constant 1.000000e+00 : f32
    %cst_18 = arith.constant -1.000000e+00 : f32
    %26 = vector.broadcast %cst_17 : f32 to vector<64x128xf32>
    %27 = vector.broadcast %cst_18 : f32 to vector<64x128xf32>
    %28 = arith.select %25, %26, %27 : vector<64x128xi1>, vector<64x128xf32>
    %29 = math.absf %23 : vector<64x128xf32>
    %cst_19 = arith.constant 0.327591091 : f32
    %30 = vector.broadcast %cst_19 : f32 to vector<64x128xf32>
    %31 = arith.mulf %30, %29 : vector<64x128xf32>
    %cst_20 = arith.constant 1.000000e+00 : f32
    %32 = vector.broadcast %cst_20 : f32 to vector<64x128xf32>
    %33 = arith.addf %32, %31 : vector<64x128xf32>
    %34 = tpu.reciprocal %33 {approx = true} : vector<64x128xf32> -> vector<64x128xf32>
    %35 = arith.mulf %33, %34 : vector<64x128xf32>
    %cst_21 = arith.constant 2.000000e+00 : f32
    %36 = vector.broadcast %cst_21 : f32 to vector<64x128xf32>
    %37 = arith.subf %36, %35 : vector<64x128xf32>
    %38 = arith.mulf %34, %37 : vector<64x128xf32>
    %cst_22 = arith.constant 1.06140542 : f32
    %39 = vector.broadcast %cst_22 : f32 to vector<64x128xf32>
    %40 = arith.mulf %39, %38 : vector<64x128xf32>
    %cst_23 = arith.constant -1.45315206 : f32
    %41 = vector.broadcast %cst_23 : f32 to vector<64x128xf32>
    %42 = arith.addf %40, %41 : vector<64x128xf32>
    %43 = arith.mulf %42, %38 : vector<64x128xf32>
    %cst_24 = arith.constant 1.42141378 : f32
    %44 = vector.broadcast %cst_24 : f32 to vector<64x128xf32>
    %45 = arith.addf %43, %44 : vector<64x128xf32>
    %46 = arith.mulf %45, %38 : vector<64x128xf32>
    %cst_25 = arith.constant -0.284496725 : f32
    %47 = vector.broadcast %cst_25 : f32 to vector<64x128xf32>
    %48 = arith.addf %46, %47 : vector<64x128xf32>
    %49 = arith.mulf %48, %38 : vector<64x128xf32>
    %cst_26 = arith.constant 0.254829586 : f32
    %50 = vector.broadcast %cst_26 : f32 to vector<64x128xf32>
    %51 = arith.addf %49, %50 : vector<64x128xf32>
    %52 = arith.mulf %51, %38 : vector<64x128xf32>
    %cst_27 = arith.constant 0.000000e+00 : f32
    %53 = vector.broadcast %cst_27 : f32 to vector<64x128xf32>
    %54 = arith.subf %53, %29 : vector<64x128xf32>
    %55 = arith.mulf %54, %29 : vector<64x128xf32>
    %56 = math.exp %55 : vector<64x128xf32>
    %57 = arith.mulf %52, %56 : vector<64x128xf32>
    %cst_28 = arith.constant 1.000000e+00 : f32
    %58 = vector.broadcast %cst_28 : f32 to vector<64x128xf32>
    %59 = arith.subf %58, %57 : vector<64x128xf32>
    %60 = arith.mulf %28, %59 : vector<64x128xf32>
    %cst_29 = arith.constant 1.000000e+00 : f32
    %61 = vector.broadcast %cst_29 : f32 to vector<64x128xf32>
    %62 = arith.addf %61, %60 : vector<64x128xf32>
    %63 = arith.mulf %21, %62 : vector<64x128xf32>
    %c0_30 = arith.constant 0 : index
    %c0_31 = arith.constant 0 : index
    %64 = vector.load %arg4[%c0_30, %c0_31] : memref<32x64xf32, #tpu.memory_space<vmem>>, vector<32x64xf32>
    %cst_32 = arith.constant dense<0.000000e+00> : vector<32x128xf32>
    %65 = tpu.matmul %64, %63, %cst_32 {dimension_numbers = #tpu.dot_dimension_numbers<[1], [0], [0], [1], [0, 0, 1, 1], [], []>} : vector<32x64xf32>, vector<64x128xf32>, vector<32x128xf32> -> vector<32x128xf32>
    %66 = vector.broadcast %2 : vector<32x1xf32> to vector<32x128xf32>
    %67 = arith.addf %65, %66 : vector<32x128xf32>
    %cst_33 = arith.constant 2.000000e+01 : f32
    %68 = vector.broadcast %cst_33 : f32 to vector<32x128xf32>
    %69 = arith.cmpf ogt, %67, %68 : vector<32x128xf32>
    %cst_34 = arith.constant 2.000000e+01 : f32
    %70 = vector.broadcast %cst_34 : f32 to vector<32x128xf32>
    %71 = arith.minimumf %67, %70 : vector<32x128xf32>
    %72 = math.exp %71 : vector<32x128xf32>
    %cst_35 = arith.constant 1.000000e+00 : f32
    %73 = vector.broadcast %cst_35 : f32 to vector<32x128xf32>
    %74 = arith.addf %73, %72 : vector<32x128xf32>
    %75 = math.log %74 : vector<32x128xf32>
    %76 = arith.select %69, %67, %75 : vector<32x128xi1>, vector<32x128xf32>
    %c0_36 = arith.constant 0 : index
    %c0_37 = arith.constant 0 : index
    %77 = vector.load %arg5[%c0_36, %c0_37] : memref<16x32xf32, #tpu.memory_space<vmem>>, vector<16x32xf32>
    %cst_38 = arith.constant dense<0.000000e+00> : vector<16x128xf32>
    %78 = tpu.matmul %77, %76, %cst_38 {dimension_numbers = #tpu.dot_dimension_numbers<[1], [0], [0], [1], [0, 0, 1, 1], [], []>} : vector<16x32xf32>, vector<32x128xf32>, vector<16x128xf32> -> vector<16x128xf32>
    %79 = vector.broadcast %3 : vector<16x1xf32> to vector<16x128xf32>
    %80 = arith.addf %78, %79 : vector<16x128xf32>
    %cst_39 = arith.constant 2.000000e+01 : f32
    %81 = vector.broadcast %cst_39 : f32 to vector<16x128xf32>
    %82 = arith.cmpf ogt, %80, %81 : vector<16x128xf32>
    %cst_40 = arith.constant 2.000000e+01 : f32
    %83 = vector.broadcast %cst_40 : f32 to vector<16x128xf32>
    %84 = arith.minimumf %80, %83 : vector<16x128xf32>
    %85 = math.exp %84 : vector<16x128xf32>
    %cst_41 = arith.constant 1.000000e+00 : f32
    %86 = vector.broadcast %cst_41 : f32 to vector<16x128xf32>
    %87 = arith.addf %86, %85 : vector<16x128xf32>
    %88 = math.log %87 : vector<16x128xf32>
    %89 = arith.select %82, %80, %88 : vector<16x128xi1>, vector<16x128xf32>
    %90 = tpu.transpose %89, [1, 0] : vector<16x128xf32> -> vector<128x16xf32>
    %c0_42 = arith.constant 0 : index
    %c0_43 = arith.constant 0 : index
    %91 = vector.load %arg7[%c0_42, %c0_43] : memref<128x16xf32, #tpu.memory_space<vmem>>, vector<128x16xf32>
    tpu.vector_store %arg7[%c0_42, %c0_43], %90 {strides = array<i32>} : memref<128x16xf32, #tpu.memory_space<vmem>>, vector<128x16xf32>,
    return
  }
  func.func @transform_0(%arg0: i32) -> (i32, i32) {
    %c0_i32 = arith.constant 0 : i32
    %c0_i32_0 = arith.constant 0 : i32
    return %arg0, %c0_i32 : i32, i32
  }
  func.func @transform_1(%arg0: i32) -> (i32, i32) {
    %c0_i32 = arith.constant 0 : i32
    %c0_i32_0 = arith.constant 0 : i32
    %c0_i32_1 = arith.constant 0 : i32
    return %c0_i32, %c0_i32_0 : i32, i32
  }
  func.func @transform_2(%arg0: i32) -> (i32, i32) {
    %c0_i32 = arith.constant 0 : i32
    %c0_i32_0 = arith.constant 0 : i32
    %c0_i32_1 = arith.constant 0 : i32
    return %c0_i32, %c0_i32_0 : i32, i32
  }
  func.func @transform_3(%arg0: i32) -> (i32, i32) {
    %c0_i32 = arith.constant 0 : i32
    %c0_i32_0 = arith.constant 0 : i32
    %c0_i32_1 = arith.constant 0 : i32
    return %c0_i32, %c0_i32_0 : i32, i32
  }
  func.func @transform_4(%arg0: i32) -> (i32, i32) {
    %c0_i32 = arith.constant 0 : i32
    %c0_i32_0 = arith.constant 0 : i32
    %c0_i32_1 = arith.constant 0 : i32
    return %c0_i32, %c0_i32_0 : i32, i32
  }
  func.func @transform_5(%arg0: i32) -> (i32, i32) {
    %c0_i32 = arith.constant 0 : i32
    %c0_i32_0 = arith.constant 0 : i32
    %c0_i32_1 = arith.constant 0 : i32
    return %c0_i32, %c0_i32_0 : i32, i32
  }
  func.func @transform_6(%arg0: i32) -> (i32, i32) {
    %c0_i32 = arith.constant 0 : i32
    %c0_i32_0 = arith.constant 0 : i32
    return %arg0, %c0_i32 : i32, i32
  }
}

</mosaic_0001>

<bundles_post_ra>
// kernel: tpu_custom_call.1
= control target key start
LH: loop header
LB: loop body
LE: loop exit
PB: predicated region body
PF: predicated region fallthrough
CT: control target
= control target key end

     0   :  { %vm81_vm0 = vcmask 261120   ;;  %v1308_v3 = vmov 0   ;;  %vm684_vm2 = vcmask 523264   ;;  %s1756_s0 = inlined_call_operand.vmem [shape: f32[128,32], index: 0, kind: input, shape index: {}]   ;;  %s1757_s1 = inlined_call_operand.vmem [shape: f32[32,32], index: 1, kind: input, shape index: {}]   ;;  %s1758_s5 = inlined_call_operand.vmem [shape: f32[144,1], index: 5, kind: input, shape index: {}]   ;;  %s1759_s2 = inlined_call_operand.vmem [shape: f32[64,32], index: 2, kind: input, shape index: {}]   ;;  %s1760_s3 = inlined_call_operand.vmem [shape: f32[32,64], index: 3, kind: input, shape index: {}]   ;;  %s1761_s4 = inlined_call_operand.vmem [shape: f32[16,32], index: 4, kind: input, shape index: {}]   ;;  %s1762_s6 = inlined_call_operand.vmem [shape: f32[128,16], index: 6, kind: output, shape index: {}]  }
   0x1   :  { %v41_v0 = vld [vmem:[%s1756_s0] sm:$0xff]  ;;  %v42_v1 = vld [vmem:[%s1756_s0 + $0x8] sm:$0xff]  ;;  %vm1353_vm1 = vmpackc.low %vm81_vm0, %vm81_vm0  ;;  %1234 = vset.pattern.permute.xlu0 %v1308_v3  ;;  %1235 = vset.pattern.permute.xlu1 %v1308_v3 }
   0x2   :  { %v1151_v4 = vpack.c.bf16 %v42_v1, %v41_v0  ;;  %v43_v5 = vld [vmem:[%s1756_s0 + $0x10] sm:$0xff]  ;;  %v44_v6 = vld [vmem:[%s1756_s0 + $0x18] sm:$0xff]  ;;  %v57_v8 = vld [vmem:[%s1757_s1] sm:$0xff] }
   0x3   :  { %v1157_v7 = vpack.c.bf16 %v44_v6, %v43_v5  ;;  %v45_v9 = vld [vmem:[%s1756_s0 + $0x20] sm:$0xff]  ;;  %v46_v10 = vld [vmem:[%s1756_s0 + $0x28] sm:$0xff]  ;;  %1092 = vmatprep.mubr.msk.f32.mxu0 %vm81_vm0, %v57_v8  ;;  %v25_v12 = vld [vmem:[%s1758_s5 + $0x10] sm:$0xff] }
   0x4   :  { %1153 = vmatprep.subr.msk.bf16.mxu0 %vm1353_vm1, %v1151_v4  ;;  %v23_v11 = vld [vmem:[%s1758_s5] sm:$0xff]  ;;  %73 = vperm.xlu1 %1235, %v25_v12   ;;  %v1163_v13 = vpack.c.bf16 %v46_v10, %v45_v9  ;;  %v24_v14 = vld [vmem:[%s1758_s5 + $0x8] sm:$0xff]  ;;  %v26_v15 = vld [vmem:[%s1758_s5 + $0x18] sm:$0xff] }
   0x5   :  { %1156 = vmatpush3.bf16.xpose.msk.msra.mxu0 %vm1353_vm1, %v1151_v4  ;;  %63 = vperm.xlu0 %1234, %v23_v11   ;;  %v27_v16 = vld [vmem:[%s1758_s5 + $0x20] sm:$0xff]  ;;  %v47_v17 = vld [vmem:[%s1756_s0 + $0x30] sm:$0xff]  ;;  %v48_v18 = vld [vmem:[%s1756_s0 + $0x38] sm:$0xff] }
   0x6   :  { %1159 = vmatprep.subr.msk.bf16.mxu0 %vm1353_vm1, %v1157_v7  ;;  %v28_v19 = vld [vmem:[%s1758_s5 + $0x28] sm:$0xff]  ;;  %v1169_v20 = vpack.c.bf16 %v48_v18, %v47_v17  ;;  %v29_v21 = vld [vmem:[%s1758_s5 + $0x30] sm:$0xff]  ;;  %v30_v22 = vld [vmem:[%s1758_s5 + $0x38] sm:$0xff] }
   0x7   :  { %v31_v23 = vld [vmem:[%s1758_s5 + $0x40] sm:$0xff]  ;;  %v50_v25 = vld [vmem:[%s1756_s0 + $0x48] sm:$0xff]  ;;  %v33_v28 = vld [vmem:[%s1758_s5 + $0x50] sm:$0xff] }
   0x8   :  { %78 = vperm.xlu1 %1235, %v26_v15   ;;  %v49_v24 = vld [vmem:[%s1756_s0 + $0x40] sm:$0xff]  ;;  %v32_v26 = vld [vmem:[%s1758_s5 + $0x48] sm:$0xff]  ;;  %v34_v29 = vld [vmem:[%s1758_s5 + $0x58] sm:$0xff] }
   0x9   :  { %68 = vperm.xlu0 %1234, %v24_v14   ;;  %v1175_v27 = vpack.c.bf16 %v50_v25, %v49_v24  ;;  %v35_v30 = vld [vmem:[%s1758_s5 + $0x60] sm:$0xff]  ;;  %v51_v31 = vld [vmem:[%s1756_s0 + $0x50] sm:$0xff]  ;;  %v52_v32 = vld [vmem:[%s1756_s0 + $0x58] sm:$0xff] }
   0xa   :  { %v36_v33 = vld [vmem:[%s1758_s5 + $0x68] sm:$0xff]  ;;  %v1181_v34 = vpack.c.bf16 %v52_v32, %v51_v31  ;;  %v37_v35 = vld [vmem:[%s1758_s5 + $0x70] sm:$0xff]  ;;  %v38_v36 = vld [vmem:[%s1758_s5 + $0x78] sm:$0xff] }
   0xb   :  { %v39_v37 = vld [vmem:[%s1758_s5 + $0x80] sm:$0xff]  ;;  %v54_v39 = vld [vmem:[%s1756_s0 + $0x68] sm:$0xff]  ;;  %v55_v42 = vld [vmem:[%s1756_s0 + $0x70] sm:$0xff] }
   0xc   :  { %266 = vperm.xlu1 %1235, %v28_v19   ;;  %v53_v38 = vld [vmem:[%s1756_s0 + $0x60] sm:$0xff]  ;;  %v40_v40 = vld [vmem:[%s1758_s5 + $0x88] sm:$0xff]  ;;  %v56_v43 = vld [vmem:[%s1756_s0 + $0x78] sm:$0xff] }
   0xd   :  { %1162 = vmatpush3.bf16.xpose.msk.msra.mxu0 %vm1353_vm1, %v1157_v7  ;;  %261 = vperm.xlu0 %1234, %v27_v16   ;;  %v1187_v41 = vpack.c.bf16 %v54_v39, %v53_v38  ;;  %v1193_v44 = vpack.c.bf16 %v56_v43, %v55_v42  ;;  %v58_v45 = vld [vmem:[%s1757_s1 + $0x8] sm:$0xff]  ;;  %v59_v46 = vld [vmem:[%s1757_s1 + $0x10] sm:$0xff]  ;;  %v60_v47 = vld [vmem:[%s1757_s1 + $0x18] sm:$0xff] }
   0xe   :  { %1165 = vmatprep.subr.msk.bf16.mxu0 %vm1353_vm1, %v1163_v13  ;;  %v251_v48 = vld [vmem:[%s1759_s2] sm:$0xff]  ;;  %v252_v19 = vld [vmem:[%s1759_s2 + $0x8] sm:$0xff]  ;;  %v257_v24 = vld [vmem:[%s1759_s2 + $0x30] sm:$0xff] }
   0xf   :  { %1106 = vmatprep.mubr.msk.f32.mxu1 %vm81_vm0, %v251_v48  ;;  %v258_v25 = vld [vmem:[%s1759_s2 + $0x38] sm:$0xff] }
  0x10   :  { %276 = vperm.xlu1 %1235, %v30_v22   ;;  %v255_v22 = vld [vmem:[%s1759_s2 + $0x20] sm:$0xff] }
  0x11   :  { %271 = vperm.xlu0 %1234, %v29_v21   ;;  %v254_v21 = vld [vmem:[%s1759_s2 + $0x18] sm:$0xff] }
  0x14   :  { %286 = vperm.xlu1 %1235, %v32_v26   ;;  %v660_v26 = vld [vmem:[%s1760_s3] sm:$0xff] }
  0x15   :  { %1168 = vmatpush3.bf16.xpose.msk.msra.mxu0 %vm1353_vm1, %v1163_v13  ;;  %281 = vperm.xlu0 %1234, %v31_v23   ;;  %v256_v23 = vld [vmem:[%s1759_s2 + $0x28] sm:$0xff] }
  0x16   :  { %1171 = vmatprep.subr.msk.bf16.mxu0 %vm1353_vm1, %v1169_v20 }
  0x18   :  { %296 = vperm.xlu1 %1235, %v34_v29  }
  0x19   :  { %291 = vperm.xlu0 %1234, %v33_v28  }
  0x1c   :  { %671 = vperm.xlu1 %1235, %v36_v33  }
  0x1d   :  { %1174 = vmatpush3.bf16.xpose.msk.msra.mxu0 %vm1353_vm1, %v1169_v20  ;;  %666 = vperm.xlu0 %1234, %v35_v30   ;;  %v253_v20 = vld [vmem:[%s1759_s2 + $0x10] sm:$0xff] }
  0x1e   :  { %1177 = vmatprep.subr.msk.bf16.mxu0 %vm1353_vm1, %v1175_v27 }
  0x20   :  { %681 = vperm.xlu1 %1235, %v38_v36  }
  0x21   :  { %676 = vperm.xlu0 %1234, %v37_v35  }
  0x24   :  { %823 = vperm.xlu1 %1235, %v40_v40  }
  0x25   :  { %1180 = vmatpush3.bf16.xpose.msk.msra.mxu0 %vm1353_vm1, %v1175_v27  ;;  %818 = vperm.xlu0 %1234, %v39_v37  }
  0x26   :  { %1183 = vmatprep.subr.msk.bf16.mxu0 %vm1353_vm1, %v1181_v34 }
  0x2d   :  { %1186 = vmatpush3.bf16.xpose.msk.msra.mxu0 %vm1353_vm1, %v1181_v34 }
  0x2e   :  { %1189 = vmatprep.subr.msk.bf16.mxu0 %vm1353_vm1, %v1187_v41 }
  0x35   :  { %1192 = vmatpush3.bf16.xpose.msk.msra.mxu0 %vm1353_vm1, %v1187_v41 }
  0x36   :  { %1195 = vmatprep.subr.msk.bf16.mxu0 %vm1353_vm1, %v1193_v44 }
  0x3d   :  { %1198 = vmatpush3.bf16.xpose.msk.msra.mxu0 %vm1353_vm1, %v1193_v44  ;;  %vm955_vm1 = vcmask 130048  }
  0x44   :  { %1093 = vmatmul.mubr.msk.f32.vlgmr.msra.gmra.mrb[0].mxu0 %vm81_vm0, %v58_v45 }
  0x45   :  { %1095 = vmatprep.mubr.msk.f32.mxu0 %vm81_vm0, %v59_v46 }
  0x48   :  { %1096 = vmatmul.mubr.msk.f32.gmra.mrb[2].mxu0 %vm81_vm0, %v60_v47 }
  0x83   :  { %v74_v50 = vpop.permute.xlu1 %73 }
  0x84   :  { %v64_v49 = vpop.permute.xlu0 %63 }
  0x87   :  { %v79_v57 = vpop.permute.xlu1 %78 }
  0x88   :  { %v69_v51 = vpop.permute.xlu0 %68 }
  0x8b   :  { %v267_v27 = vpop.permute.xlu1 %266 }
  0x8c   :  { %v262_v28 = vpop.permute.xlu0 %261 }
  0x8f   :  { %v277_v34 = vpop.permute.xlu1 %276 }
  0x90   :  { %v272_v37 = vpop.permute.xlu0 %271 }
 0x117   :  { %v1094_v52 = vpop.f32.mrb[0].mxu0 }
 0x118   :  { %v214_v53 = vadd.f32 %v1094_v52, %v69_v51  ;;  %v208_v54 = vpop.f32.mrb[1].mxu0  ;;  %v287_v52 = vpop.permute.xlu1 %286 }
 0x119   :  { %v209_v55 = vadd.f32 %v208_v54, %v64_v49 }
 0x11a   :  { %v228_v56 = vsub.f32 0.0, %v214_v53 }
 0x11b   :  { %v227_v58 = vsub.f32 0.0, %v209_v55  ;;  %v1097_v59 = vpop.f32.mrb[2].mxu0  ;;  %v282_v55 = vpop.permute.xlu0 %281 }
 0x11c   :  { %v233_v60 = vmul.f32 1.442695, %v228_v56  ;;  %v224_v61 = vadd.f32 %v1097_v59, %v79_v57  ;;  %v218_v62 = vpop.f32.mrb[3].mxu0 }
 0x11d   :  { %v231_v63 = vmul.f32 1.442695, %v227_v58  ;;  %v219_v0 = vadd.f32 %v218_v62, %v74_v50 }
 0x11e   :  { %1236 = vpow2.f32 %v233_v60  ;;  %v230_v1 = vsub.f32 0.0, %v224_v61 }
 0x11f   :  { %1238 = vpow2.f32 %v231_v63  ;;  %v229_v2 = vsub.f32 0.0, %v219_v0 }
 0x120   :  { %v237_v3 = vmul.f32 1.442695, %v230_v1 }
 0x121   :  { %v235_v4 = vmul.f32 1.442695, %v229_v2 }
 0x122   :  { %1240 = vpow2.f32 %v237_v3 }
 0x123   :  { %1242 = vpow2.f32 %v235_v4 }
 0x128   :  { %v1237_v5 = vpop.eup %1236 }
 0x129   :  { %v1239_v6 = vpop.eup %1238  ;;  %v240_v7 = vadd.f32 1.0, %v1237_v5 }
 0x12a   :  { %v239_v8 = vadd.f32 1.0, %v1239_v6 }
 0x12b   :  { %1244 = vrcp.f32 %v240_v7  ;;  %v1309_v7 = vmov -1.0  }
 0x12c   :  { %v1241_v9 = vpop.eup %1240  ;;  %1246 = vrcp.f32 %v239_v8 }
 0x12d   :  { %v1243_v10 = vpop.eup %1242  ;;  %v242_v11 = vadd.f32 1.0, %v1241_v9 }
 0x12e   :  { %v241_v12 = vadd.f32 1.0, %v1243_v10 }
 0x12f   :  { %1248 = vrcp.f32 %v242_v11 }
 0x130   :  { %1250 = vrcp.f32 %v241_v12  ;;  %v297_v12 = vpop.permute.xlu1 %296 }
 0x135   :  { %v1245_v13 = vpop.eup %1244 }
 0x136   :  { %v1247_v14 = vpop.eup %1246 }
 0x137   :  { %v1199_v15 = vpack.c.bf16 %v1245_v13, %v1247_v14 }
 0x139   :  { %v1249_v16 = vpop.eup %1248  ;;  %1200 = vmatprep.subr.bf16.mxu1 %v1199_v15 }
 0x13a   :  { %v1251_v17 = vpop.eup %1250  ;;  %1202 = vmatpush3.bf16.msra.mxu1 %v1199_v15 }
 0x13b   :  { %v1203_v18 = vpack.c.bf16 %v1249_v16, %v1251_v17 }
 0x13d   :  { %1204 = vmatprep.subr.bf16.mxu1 %v1203_v18 }
 0x13e   :  { %1206 = vmatpush3.bf16.msra.mxu1 %v1203_v18 }
 0x141   :  { %1107 = vmatmul.mubr.msk.f32.vlgmr.msra.gmra.mrb[0].mxu1 %vm81_vm0, %v252_v19 }
 0x142   :  { %1109 = vmatprep.mubr.msk.f32.mxu1 %vm81_vm0, %v253_v20 }
 0x145   :  { %1110 = vmatmul.mubr.msk.f32.gmra.mrb[2].mxu1 %vm81_vm0, %v254_v21  ;;  %v292_v21 = vpop.permute.xlu0 %291 }
 0x146   :  { %1112 = vmatprep.mubr.msk.f32.mxu1 %vm81_vm0, %v255_v22 }
 0x149   :  { %1113 = vmatmul.mubr.msk.f32.gmra.mrb[4].mxu1 %vm81_vm0, %v256_v23 }
 0x14a   :  { %1115 = vmatprep.mubr.msk.f32.mxu1 %vm81_vm0, %v257_v24 }
 0x14d   :  { %1116 = vmatmul.mubr.msk.f32.gmra.mrb[6].mxu1 %vm81_vm0, %v258_v25 }
 0x14e   :  { %1134 = vmatprep.mubr.msk.f32.mxu1 %vm684_vm2, %v660_v26 }
 0x214   :  { %v1108_v29 = vpop.f32.mrb[0].mxu1 }
 0x215   :  { %v395_v30 = vadd.f32 %v1108_v29, %v267_v27  ;;  %v389_v31 = vpop.f32.mrb[1].mxu1 }
 0x216   :  { %v390_v32 = vadd.f32 %v389_v31, %v262_v28 }
 0x217   :  { %v437_v33 = vmul.f32 0.70710677, %v395_v30  ;;  %v1553_v3 = vmul.f32 0.5, %v395_v30 }
 0x218   :  { %v436_v35 = vmul.f32 0.70710677, %v390_v32  ;;  %v1111_v36 = vpop.f32.mrb[2].mxu1  ;;  %v1559_v9 = vmul.f32 0.5, %v390_v32 }
 0x219   :  { %v461_v38 = vand.u32 2147483647, %v437_v33  ;;  %v405_v39 = vadd.f32 %v1111_v36, %v277_v34  ;;  %v399_v40 = vpop.f32.mrb[3].mxu1  ;;  %vm445_vm3 = vcmp.ge.f32.partialorder %v437_v33, 0.0 }
 0x21a   :  { %v460_v41 = vand.u32 2147483647, %v436_v35  ;;  %v1537_v42 = vadd.f32 %v399_v40, %v272_v37  ;;  %vm444_vm4 = vcmp.ge.f32.partialorder %v436_v35, 0.0  ;;  %v1557_v8 = vsel %vm445_vm3, 1.0, %v1309_v7 }
 0x21b   :  { %v469_v43 = vmul.f32 0.3275911, %v461_v38  ;;  %v439_v45 = vmul.f32 0.70710677, %v405_v39  ;;  %v589_v56 = vsub.f32 0.0, %v461_v38  ;;  %v1563_v13 = vsel %vm444_vm4, 1.0, %v1309_v7 }
 0x21c   :  { %v468_v44 = vmul.f32 0.3275911, %v460_v41  ;;  %v1540_v47 = vmul.f32 0.70710677, %v1537_v42  ;;  %v1114_v48 = vpop.f32.mrb[4].mxu1  ;;  %v588_v62 = vsub.f32 0.0, %v460_v41 }
 0x21d   :  { %v477_v46 = vadd.f32 1.0, %v469_v43  ;;  %v463_v50 = vand.u32 2147483647, %v439_v45  ;;  %v409_v51 = vpop.f32.mrb[5].mxu1  ;;  %v1543_v58 = vadd.f32 %v1114_v48, %v287_v52  ;;  %v597_v4 = vmul.f32 %v589_v56, %v461_v38 }
 0x21e   :  { %v476_v49 = vadd.f32 1.0, %v468_v44  ;;  %v462_v57 = vand.u32 2147483647, %v1540_v47  ;;  %v1545_v61 = vadd.f32 %v409_v51, %v282_v55  ;;  %v596_v14 = vmul.f32 %v588_v62, %v460_v41 }
 0x21f   :  { %1252 = vrcp.f32 %v477_v46  ;;  %v471_v53 = vmul.f32 0.3275911, %v463_v50  ;;  %v1548_v0 = vmul.f32 0.70710677, %v1543_v58  ;;  %v591_v1 = vsub.f32 0.0, %v463_v50 }
 0x220   :  { %1254 = vrcp.f32 %v476_v49  ;;  %v1117_v54 = vpop.f32.mrb[6].mxu1  ;;  %v470_v63 = vmul.f32 0.3275911, %v462_v57  ;;  %v1551_v2 = vmul.f32 0.70710677, %v1545_v61  ;;  %v590_v10 = vsub.f32 0.0, %v462_v57 }
 0x221   :  { %v419_v59 = vpop.f32.mrb[7].mxu1  ;;  %v479_v60 = vadd.f32 1.0, %v471_v53  ;;  %v465_v6 = vand.u32 2147483647, %v1548_v0  ;;  %v1565_v16 = vmul.f32 0.5, %v405_v39  ;;  %v599_v17 = vmul.f32 %v591_v1, %v463_v50 }
 0x222   :  { %v478_v5 = vadd.f32 1.0, %v470_v63  ;;  %v464_v11 = vand.u32 2147483647, %v1551_v2  ;;  %v1567_v19 = vadd.f32 %v1117_v54, %v297_v12  ;;  %v606_v22 = vmul.f32 1.442695, %v597_v4 }
 0x223   :  { %1256 = vrcp.f32 %v479_v60  ;;  %v473_v15 = vmul.f32 0.3275911, %v465_v6  ;;  %vm447_vm5 = vcmp.ge.f32.partialorder %v439_v45, 0.0  ;;  %vm446_vm6 = vcmp.ge.f32.partialorder %v1540_v47, 0.0 }
 0x224   :  { %1258 = vrcp.f32 %v478_v5  ;;  %v472_v18 = vmul.f32 0.3275911, %v464_v11  ;;  %v598_v26 = vmul.f32 %v590_v10, %v462_v57  ;;  %v1570_v28 = vadd.f32 %v419_v59, %v292_v21 }
 0x225   :  { %v481_v23 = vadd.f32 1.0, %v473_v15  ;;  %v604_v30 = vmul.f32 1.442695, %v596_v14  ;;  %v1573_v31 = vmul.f32 0.70710677, %v1567_v19  ;;  %v1576_v33 = vsel %vm447_vm5, 1.0, %v1309_v7 }
 0x226   :  { %v480_v27 = vadd.f32 1.0, %v472_v18  ;;  %v610_v34 = vmul.f32 1.442695, %v599_v17  ;;  %v593_v36 = vsub.f32 0.0, %v465_v6  ;;  %v1584_v40 = vsel %vm446_vm6, 1.0, %v1309_v7 }
 0x227   :  { %1260 = vrcp.f32 %v481_v23  ;;  %v467_v37 = vand.u32 2147483647, %v1573_v31  ;;  %v608_v41 = vmul.f32 1.442695, %v598_v26  ;;  %v1587_v43 = vmul.f32 0.70710677, %v1570_v28 }
 0x228   :  { %1262 = vrcp.f32 %v480_v27  ;;  %v601_v53 = vmul.f32 %v593_v36, %v465_v6  ;;  %vm449_vm7 = vcmp.ge.f32.partialorder %v1548_v0, 0.0  ;;  %vm448_vm8 = vcmp.ge.f32.partialorder %v1551_v2, 0.0 }
 0x229   :  { %v1253_v20 = vpop.eup %1252  ;;  %1264 = vpow2.f32 %v606_v22  ;;  %v466_v50 = vand.u32 2147483647, %v1587_v43  ;;  %v456_v2 = vsel %vm448_vm8, 1.0, %v1309_v7  ;;  %vm451_vm9 = vcmp.ge.f32.partialorder %v1573_v31, 0.0 }
 0x22a   :  { %v1255_v24 = vpop.eup %1254  ;;  %v493_v25 = vmul.f32 %v1253_v20, %v477_v46  ;;  %1266 = vpow2.f32 %v604_v30  ;;  %v475_v46 = vmul.f32 0.3275911, %v467_v37  ;;  %v614_v15 = vmul.f32 1.442695, %v601_v53 }
 0x22b   :  { %v492_v29 = vmul.f32 %v1255_v24, %v476_v49  ;;  %1268 = vpow2.f32 %v610_v34  ;;  %v592_v49 = vsub.f32 0.0, %v464_v11  ;;  %v474_v57 = vmul.f32 0.3275911, %v466_v50 }
 0x22c   :  { %v501_v32 = vsub.f32 2.0, %v493_v25  ;;  %v483_v54 = vadd.f32 1.0, %v475_v46  ;;  %1270 = vpow2.f32 %v608_v41  ;;  %v594_v17 = vsub.f32 0.0, %v466_v50 }
 0x22d   :  { %v500_v35 = vsub.f32 2.0, %v492_v29  ;;  %v1257_v38 = vpop.eup %1256  ;;  %v600_v4 = vmul.f32 %v592_v49, %v464_v11  ;;  %v482_v10 = vadd.f32 1.0, %v474_v57  ;;  %vm450_vm10 = vcmp.ge.f32.partialorder %v1587_v43, 0.0  ;;  %v661_v43 = vld [vmem:[%s1760_s3 + $0x8] sm:$0xff] }
 0x22e   :  { %v1579_v39 = vmul.f32 %v1253_v20, %v501_v32  ;;  %v495_v45 = vmul.f32 %v1257_v38, %v479_v60  ;;  %v1259_v51 = vpop.eup %1258  ;;  %1272 = vrcp.f32 %v483_v54  ;;  %v595_v60 = vsub.f32 0.0, %v467_v37 }
 0x22f   :  { %v1589_v44 = vmul.f32 %v1255_v24, %v500_v35  ;;  %v494_v56 = vmul.f32 %v1259_v51, %v478_v5  ;;  %1274 = vrcp.f32 %v482_v10  ;;  %v612_v34 = vmul.f32 1.442695, %v600_v4 }
 0x230   :  { %v517_v48 = vmul.f32 1.0614054, %v1579_v39  ;;  %v503_v52 = vsub.f32 2.0, %v495_v45  ;;  %v603_v29 = vmul.f32 %v595_v60, %v467_v37  ;;  %v602_v45 = vmul.f32 %v594_v17, %v466_v50 }
 0x231   :  { %v516_v47 = vmul.f32 1.0614054, %v1589_v44  ;;  %v502_v1 = vsub.f32 2.0, %v494_v56  ;;  %v1261_v12 = vpop.eup %1260  ;;  %1276 = vpow2.f32 %v614_v15  ;;  %v458_v31 = vsel %vm450_vm10, 1.0, %v1309_v7 }
 0x232   :  { %v525_v55 = vadd.f32 -1.4531521, %v517_v48  ;;  %v1594_v62 = vmul.f32 %v1257_v38, %v503_v52  ;;  %v1263_v5 = vpop.eup %1262  ;;  %v497_v21 = vmul.f32 %v1261_v12, %v481_v23  ;;  %1278 = vpow2.f32 %v612_v34 }
 0x233   :  { %v524_v59 = vadd.f32 -1.4531521, %v516_v47  ;;  %v1599_v20 = vmul.f32 %v1259_v51, %v502_v1  ;;  %v1265_v22 = vpop.eup %1264  ;;  %v496_v26 = vmul.f32 %v1263_v5, %v480_v27  ;;  %v618_v47 = vmul.f32 1.442695, %v603_v29 }
 0x234   :  { %v533_v63 = vmul.f32 %v525_v55, %v1579_v39  ;;  %v519_v6 = vmul.f32 1.0614054, %v1594_v62  ;;  %v505_v32 = vsub.f32 2.0, %v497_v21  ;;  %v1267_v35 = vpop.eup %1266 }
 0x235   :  { %v532_v14 = vmul.f32 %v524_v59, %v1589_v44  ;;  %v518_v30 = vmul.f32 1.0614054, %v1599_v20  ;;  %v504_v41 = vsub.f32 2.0, %v496_v26  ;;  %v1269_v23 = vpop.eup %1268  ;;  %1280 = vpow2.f32 %v618_v47 }
 0x236   :  { %v541_v18 = vadd.f32 1.4214138, %v533_v63  ;;  %v527_v25 = vadd.f32 -1.4531521, %v519_v6  ;;  %v1605_v49 = vmul.f32 %v1261_v12, %v505_v32  ;;  %v1609_v52 = vpop.eup %1270  ;;  %v1617_v63 = vmul.f32 1.442695, %v602_v45 }
 0x237   :  { %v540_v24 = vadd.f32 1.4214138, %v532_v14  ;;  %v526_v48 = vadd.f32 -1.4531521, %v518_v30  ;;  %v1607_v51 = vmul.f32 %v1263_v5, %v504_v41 }
 0x238   :  { %v549_v11 = vmul.f32 %v541_v18, %v1579_v39  ;;  %v535_v38 = vmul.f32 %v527_v25, %v1594_v62  ;;  %v521_v56 = vmul.f32 1.0614054, %v1605_v49  ;;  %v1273_v50 = vpop.eup %1272  ;;  %1282 = vpow2.f32 %v1617_v63 }
 0x239   :  { %v548_v36 = vmul.f32 %v540_v24, %v1589_v44  ;;  %v534_v55 = vmul.f32 %v526_v48, %v1599_v20  ;;  %v520_v60 = vmul.f32 1.0614054, %v1607_v51  ;;  %v499_v14 = vmul.f32 %v1273_v50, %v483_v54  ;;  %v1275_v5 = vpop.eup %1274 }
 0x23a   :  { %v557_v46 = vadd.f32 -0.28449672, %v549_v11  ;;  %v543_v37 = vadd.f32 1.4214138, %v535_v38  ;;  %v529_v12 = vadd.f32 -1.4531521, %v521_v56  ;;  %v498_v30 = vmul.f32 %v1275_v5, %v482_v10 }
 0x23b   :  { %v556_v27 = vadd.f32 -0.28449672, %v548_v36  ;;  %v542_v4 = vadd.f32 1.4214138, %v534_v55  ;;  %v528_v17 = vadd.f32 -1.4531521, %v520_v60 }
 0x23c   :  { %v565_v53 = vmul.f32 %v557_v46, %v1579_v39  ;;  %v551_v59 = vmul.f32 %v543_v37, %v1594_v62  ;;  %v537_v24 = vmul.f32 %v529_v12, %v1605_v49  ;;  %v507_v25 = vsub.f32 2.0, %v499_v14  ;;  %v1277_v46 = vpop.eup %1276 }
 0x23d   :  { %v564_v57 = vmul.f32 %v556_v27, %v1589_v44  ;;  %v550_v21 = vmul.f32 %v542_v4, %v1599_v20  ;;  %v536_v11 = vmul.f32 %v528_v17, %v1607_v51  ;;  %v506_v45 = vsub.f32 2.0, %v498_v30  ;;  %v1279_v55 = vpop.eup %1278 }
 0x23e   :  { %v573_v1 = vadd.f32 0.2548296, %v565_v53  ;;  %v559_v15 = vadd.f32 -0.28449672, %v551_v59  ;;  %v545_v34 = vadd.f32 1.4214138, %v537_v24  ;;  %v1625_v36 = vmul.f32 %v1273_v50, %v507_v25 }
 0x23f   :  { %v572_v6 = vadd.f32 0.2548296, %v564_v57  ;;  %v558_v32 = vadd.f32 -0.28449672, %v550_v21  ;;  %v1632_v53 = vmul.f32 %v1275_v5, %v506_v45 }
 0x240   :  { %v581_v18 = vmul.f32 %v573_v1, %v1579_v39  ;;  %v567_v29 = vmul.f32 %v559_v15, %v1594_v62  ;;  %v544_v39 = vadd.f32 1.4214138, %v536_v11  ;;  %v523_v37 = vmul.f32 1.0614054, %v1625_v36  ;;  %v1281_v15 = vpop.eup %1280 }
 0x241   :  { %v580_v26 = vmul.f32 %v572_v6, %v1589_v44  ;;  %v566_v27 = vmul.f32 %v558_v32, %v1599_v20  ;;  %v553_v44 = vmul.f32 %v545_v34, %v1605_v49  ;;  %v522_v4 = vmul.f32 1.0614054, %v1632_v53 }
 0x242   :  { %v621_v54 = vmul.f32 %v1265_v22, %v581_v18  ;;  %v575_v41 = vadd.f32 0.2548296, %v567_v29  ;;  %v552_v22 = vmul.f32 %v544_v39, %v1607_v51  ;;  %v531_v57 = vadd.f32 -1.4531521, %v523_v37 }
 0x243   :  { %v620_v38 = vmul.f32 %v1267_v35, %v580_v26  ;;  %v574_v56 = vadd.f32 0.2548296, %v566_v27  ;;  %v561_v50 = vadd.f32 -0.28449672, %v553_v44  ;;  %v530_v18 = vadd.f32 -1.4531521, %v522_v4  ;;  %v1283_v4 = vpop.eup %1282 }
 0x244   :  { %v629_v48 = vsub.f32 1.0, %v621_v54  ;;  %v583_v10 = vmul.f32 %v575_v41, %v1594_v62  ;;  %v560_v1 = vadd.f32 -0.28449672, %v552_v22  ;;  %v539_v6 = vmul.f32 %v531_v57, %v1625_v36 }
 0x245   :  { %v628_v47 = vsub.f32 1.0, %v620_v38  ;;  %v582_v14 = vmul.f32 %v574_v56, %v1599_v20  ;;  %v569_v62 = vmul.f32 %v561_v50, %v1605_v49  ;;  %v538_v29 = vmul.f32 %v530_v18, %v1632_v53 }
 0x246   :  { %v637_v35 = vmul.f32 %v629_v48, %v1557_v8  ;;  %v623_v60 = vmul.f32 %v1269_v23, %v583_v10  ;;  %v568_v8 = vmul.f32 %v560_v1, %v1607_v51  ;;  %v547_v24 = vadd.f32 1.4214138, %v539_v6 }
 0x247   :  { %v636_v59 = vmul.f32 %v628_v47, %v1563_v13  ;;  %v622_v13 = vmul.f32 %v1609_v52, %v582_v14  ;;  %v577_v23 = vadd.f32 0.2548296, %v569_v62  ;;  %v546_v52 = vadd.f32 1.4214138, %v538_v29 }
 0x248   :  { %v645_v12 = vadd.f32 1.0, %v637_v35  ;;  %v631_v5 = vsub.f32 1.0, %v623_v60  ;;  %v576_v26 = vadd.f32 0.2548296, %v568_v8  ;;  %v555_v54 = vmul.f32 %v547_v24, %v1625_v36 }
 0x249   :  { %v644_v17 = vadd.f32 1.0, %v636_v59  ;;  %v630_v11 = vsub.f32 1.0, %v622_v13  ;;  %v585_v30 = vmul.f32 %v577_v23, %v1605_v49  ;;  %v554_v49 = vmul.f32 %v546_v52, %v1632_v53  ;;  %v672_v13 = vpop.permute.xlu1 %671  ;;  %v667_v23 = vpop.permute.xlu0 %666 }
 0x24a   :  { %v653_v21 = vmul.f32 %v645_v12, %v1553_v3  ;;  %v639_v20 = vmul.f32 %v631_v5, %v1576_v33  ;;  %v584_v3 = vmul.f32 %v576_v26, %v1607_v51  ;;  %v563_v41 = vadd.f32 -0.28449672, %v555_v54 }
 0x24b   :  { %v652_v25 = vmul.f32 %v644_v17, %v1559_v9  ;;  %v638_v38 = vmul.f32 %v630_v11, %v1584_v40  ;;  %v625_v9 = vmul.f32 %v1277_v46, %v585_v30  ;;  %v430_v33 = vmul.f32 0.5, %v1537_v42 }
 0x24c   :  { %v647_v32 = vadd.f32 1.0, %v639_v20  ;;  %v624_v39 = vmul.f32 %v1279_v55, %v584_v3  ;;  %v571_v27 = vmul.f32 %v563_v41, %v1625_v36  ;;  %v457_v40 = vsel %vm449_vm7, 1.0, %v1309_v7 }
 0x24d   :  { %v1207_v34 = vpack.c.bf16 %v653_v21, %v652_v25  ;;  %v646_v48 = vadd.f32 1.0, %v638_v38  ;;  %v633_v51 = vsub.f32 1.0, %v625_v9  ;;  %v562_v46 = vadd.f32 -0.28449672, %v554_v49  ;;  %v682_v11 = vpop.permute.xlu1 %681 }
 0x24e   :  { %v655_v45 = vmul.f32 %v647_v32, %v1565_v16  ;;  %v632_v63 = vsub.f32 1.0, %v624_v39  ;;  %v579_v37 = vadd.f32 0.2548296, %v571_v27  ;;  %v433_v16 = vmul.f32 0.5, %v1543_v58  ;;  %v677_v32 = vpop.permute.xlu0 %676 }
 0x24f   :  { %1208 = vmatprep.subr.bf16.mxu1 %v1207_v34  ;;  %v654_v42 = vmul.f32 %v646_v48, %v430_v33  ;;  %v641_v44 = vmul.f32 %v633_v51, %v457_v40  ;;  %v570_v10 = vmul.f32 %v562_v46, %v1632_v53  ;;  %v432_v56 = vmul.f32 0.5, %v1545_v61 }
 0x250   :  { %1210 = vmatpush3.bf16.msra.mxu1 %v1207_v34  ;;  %v640_v47 = vmul.f32 %v632_v63, %v456_v2  ;;  %v587_v55 = vmul.f32 %v579_v37, %v1625_v36  ;;  %v459_v58 = vsel %vm451_vm9, 1.0, %v1309_v7  ;;  %v434_v5 = vmul.f32 0.5, %v1570_v28  ;;  %v662_v7 = vld [vmem:[%s1760_s3 + $0x10] sm:$0xff]  ;;  %v814_v28 = vld [vmem:[%s1761_s4] sm:$0xff] }
 0x251   :  { %v649_v22 = vadd.f32 1.0, %v641_v44  ;;  %v1211_v35 = vpack.c.bf16 %v655_v45, %v654_v42  ;;  %v578_v50 = vadd.f32 0.2548296, %v570_v10 }
 0x252   :  { %v648_v0 = vadd.f32 1.0, %v640_v47  ;;  %v627_v59 = vmul.f32 %v1281_v15, %v587_v55  ;;  %v435_v15 = vmul.f32 0.5, %v1567_v19  ;;  %v663_v19 = vld [vmem:[%s1760_s3 + $0x18] sm:$0xff] }
 0x253   :  { %v657_v57 = vmul.f32 %v649_v22, %v433_v16  ;;  %1212 = vmatprep.subr.bf16.mxu1 %v1211_v35  ;;  %v586_v1 = vmul.f32 %v578_v50, %v1632_v53 }
 0x254   :  { %v656_v60 = vmul.f32 %v648_v0, %v432_v56  ;;  %1214 = vmatpush3.bf16.msra.mxu1 %v1211_v35  ;;  %v635_v12 = vsub.f32 1.0, %v627_v59 }
 0x255   :  { %v626_v36 = vmul.f32 %v1283_v4, %v586_v1  ;;  %v824_v1 = vpop.permute.xlu1 %823 }
 0x256   :  { %v1215_v14 = vpack.c.bf16 %v657_v57, %v656_v60  ;;  %v643_v61 = vmul.f32 %v635_v12, %v459_v58  ;;  %v815_v60 = vld [vmem:[%s1761_s4 + $0x8] sm:$0xff]  ;;  %v819_v12 = vpop.permute.xlu0 %818 }
 0x257   :  { %v634_v62 = vsub.f32 1.0, %v626_v36 }
 0x258   :  { %1216 = vmatprep.subr.bf16.mxu1 %v1215_v14  ;;  %v651_v6 = vadd.f32 1.0, %v643_v61 }
 0x259   :  { %1218 = vmatpush3.bf16.msra.mxu1 %v1215_v14  ;;  %v642_v17 = vmul.f32 %v634_v62, %v458_v31 }
 0x25a   :  { %v659_v53 = vmul.f32 %v651_v6, %v435_v15 }
 0x25b   :  { %v650_v8 = vadd.f32 1.0, %v642_v17 }
 0x25d   :  { %v658_v18 = vmul.f32 %v650_v8, %v434_v5 }
 0x25f   :  { %v1219_v21 = vpack.c.bf16 %v659_v53, %v658_v18 }
 0x261   :  { %1220 = vmatprep.subr.bf16.mxu1 %v1219_v21 }
 0x262   :  { %1222 = vmatpush3.bf16.msra.mxu1 %v1219_v21 }
 0x265   :  { %1135 = vmatmul.mubr.msk.f32.vlgmr.msra.gmra.mrb[8].mxu1 %vm684_vm2, %v661_v43 }
 0x266   :  { %1137 = vmatprep.mubr.msk.f32.mxu1 %vm684_vm2, %v662_v7 }
 0x269   :  { %1138 = vmatmul.mubr.msk.f32.gmra.mrb[10].mxu1 %vm684_vm2, %v663_v19 }
 0x26a   :  { %1148 = vmatprep.mubr.msk.f32.mxu1 %vm81_vm0, %v814_v28 }
 0x338   :  { %v1136_v24 = vpop.f32.mrb[8].mxu1 }
 0x339   :  { %v769_v25 = vadd.f32 %v1136_v24, %v672_v13  ;;  %v763_v20 = vpop.f32.mrb[9].mxu1 }
 0x33a   :  { %v764_v26 = vadd.f32 %v763_v20, %v667_v23 }
 0x33b   :  { %v787_v29 = vmin.f32 %v769_v25, 20.0  ;;  %vm783_vm11 = vcmp.gt.f32.partialorder %v769_v25, 20.0 }
 0x33c   :  { %v786_v30 = vmin.f32 %v764_v26, 20.0  ;;  %v1139_v54 = vpop.f32.mrb[10].mxu1  ;;  %vm782_vm12 = vcmp.gt.f32.partialorder %v764_v26, 20.0 }
 0x33d   :  { %v792_v3 = vmul.f32 1.442695, %v787_v29  ;;  %v779_v52 = vadd.f32 %v1139_v54, %v682_v11  ;;  %v773_v34 = vpop.f32.mrb[11].mxu1 }
 0x33e   :  { %v790_v38 = vmul.f32 1.442695, %v786_v30  ;;  %v774_v9 = vadd.f32 %v773_v34, %v677_v32 }
 0x33f   :  { %1284 = vpow2.f32 %v792_v3  ;;  %v789_v41 = vmin.f32 %v779_v52, 20.0  ;;  %vm785_vm13 = vcmp.gt.f32.partialorder %v779_v52, 20.0 }
 0x340   :  { %1286 = vpow2.f32 %v790_v38  ;;  %v788_v33 = vmin.f32 %v774_v9, 20.0  ;;  %vm784_vm14 = vcmp.gt.f32.partialorder %v774_v9, 20.0 }
 0x341   :  { %v796_v39 = vmul.f32 1.442695, %v789_v41 }
 0x342   :  { %v794_v49 = vmul.f32 1.442695, %v788_v33 }
 0x343   :  { %1288 = vpow2.f32 %v796_v39 }
 0x344   :  { %1290 = vpow2.f32 %v794_v49 }
 0x349   :  { %v1285_v45 = vpop.eup %1284 }
 0x34a   :  { %v1287_v48 = vpop.eup %1286  ;;  %v799_v51 = vadd.f32 1.0, %v1285_v45 }
 0x34b   :  { %v798_v27 = vadd.f32 1.0, %v1287_v48 }
 0x34c   :  { %1292 = vlog2.f32 %v799_v51 }
 0x34d   :  { %v1289_v40 = vpop.eup %1288  ;;  %1294 = vlog2.f32 %v798_v27 }
 0x34e   :  { %v1291_v63 = vpop.eup %1290  ;;  %v801_v46 = vadd.f32 1.0, %v1289_v40 }
 0x34f   :  { %v800_v42 = vadd.f32 1.0, %v1291_v63 }
 0x350   :  { %1296 = vlog2.f32 %v801_v46 }
 0x351   :  { %1298 = vlog2.f32 %v800_v42 }
 0x356   :  { %v1293_v44 = vpop.eup %1292 }
 0x357   :  { %v1295_v2 = vpop.eup %1294  ;;  %v805_v37 = vmul.f32 0.6931472, %v1293_v44 }
 0x358   :  { %v803_v47 = vmul.f32 0.6931472, %v1295_v2 }
 0x359   :  { %v811_v10 = vsel %vm783_vm11, %v769_v25, %v805_v37 }
 0x35a   :  { %v1297_v16 = vpop.eup %1296  ;;  %v810_v22 = vsel %vm782_vm12, %v764_v26, %v803_v47 }
 0x35b   :  { %v1299_v55 = vpop.eup %1298  ;;  %v1223_v35 = vpack.c.bf16 %v811_v10, %v810_v22  ;;  %v809_v56 = vmul.f32 0.6931472, %v1297_v16 }
 0x35c   :  { %v807_v0 = vmul.f32 0.6931472, %v1299_v55 }
 0x35d   :  { %1224 = vmatprep.subr.bf16.mxu1 %v1223_v35  ;;  %v813_v50 = vsel %vm785_vm13, %v779_v52, %v809_v56 }
 0x35e   :  { %1226 = vmatpush3.bf16.msra.mxu1 %v1223_v35  ;;  %v812_v57 = vsel %vm784_vm14, %v774_v9, %v807_v0 }
 0x35f   :  { %v1227_v59 = vpack.c.bf16 %v813_v50, %v812_v57 }
 0x361   :  { %1228 = vmatprep.subr.bf16.mxu1 %v1227_v59 }
 0x362   :  { %1230 = vmatpush3.bf16.msra.mxu1 %v1227_v59 }
 0x365   :  { %1149 = vmatmul.mubr.msk.f32.vlgmr.msra.gmra.mrb[12].mxu1 %vm81_vm0, %v815_v60 }
 0x438   :  { %v1150_v4 = vpop.f32.mrb[12].mxu1 }
 0x439   :  { %v904_v58 = vadd.f32 %v1150_v4, %v824_v1  ;;  %v898_v36 = vpop.f32.mrb[13].mxu1 }
 0x43a   :  { %v899_v14 = vadd.f32 %v898_v36, %v819_v12 }
 0x43b   :  { %v910_v61 = vmin.f32 %v904_v58, 20.0  ;;  %vm908_vm0 = vcmp.gt.f32.partialorder %v904_v58, 20.0 }
 0x43c   :  { %v909_v62 = vmin.f32 %v899_v14, 20.0  ;;  %vm907_vm15 = vcmp.gt.f32.partialorder %v899_v14, 20.0 }
 0x43d   :  { %v913_v6 = vmul.f32 1.442695, %v910_v61 }
 0x43e   :  { %v911_v31 = vmul.f32 1.442695, %v909_v62 }
 0x43f   :  { %1300 = vpow2.f32 %v913_v6 }
 0x440   :  { %1302 = vpow2.f32 %v911_v31 }
 0x449   :  { %v1301_v15 = vpop.eup %1300 }
 0x44a   :  { %v1303_v17 = vpop.eup %1302  ;;  %v916_v53 = vadd.f32 1.0, %v1301_v15 }
 0x44b   :  { %v915_v5 = vadd.f32 1.0, %v1303_v17 }
 0x44c   :  { %1304 = vlog2.f32 %v916_v53 }
 0x44d   :  { %1306 = vlog2.f32 %v915_v5 }
 0x456   :  { %v1305_v8 = vpop.eup %1304 }
 0x457   :  { %v1307_v18 = vpop.eup %1306  ;;  %v920_v7 = vmul.f32 0.6931472, %v1305_v8 }
 0x458   :  { %v918_v21 = vmul.f32 0.6931472, %v1307_v18 }
 0x459   :  { %v922_v19 = vsel %vm908_vm0, %v904_v58, %v920_v7 }
 0x45a   :  { %v921_v43 = vsel %vm907_vm15, %v899_v14, %v918_v21 }
 0x45b   :  { %923 = vxpose.xlu0.b32.start [1/2] (short) %v921_v43, 128 }
 0x45f   :  { %924 = vxpose.xlu0.b32.end [2/2] (short) %v922_v19, 128 }
 0x4db   :  { %v939_v28 = vpop.trf.xlu0 }
 0x4dc   :  { %956 = vst.msk [vmem:[%s1762_s6] sm:$0xff] %vm955_vm1, %v939_v28 }
 0x4df   :  { %v940_v13 = vpop.trf.xlu0 }
 0x4e0   :  { %957 = vst.msk [vmem:[%s1762_s6 + $0x8] sm:$0xff] %vm955_vm1, %v940_v13 }
 0x4e3   :  { %v941_v23 = vpop.trf.xlu0 }
 0x4e4   :  { %958 = vst.msk [vmem:[%s1762_s6 + $0x10] sm:$0xff] %vm955_vm1, %v941_v23 }
 0x4e7   :  { %v942_v24 = vpop.trf.xlu0 }
 0x4e8   :  { %959 = vst.msk [vmem:[%s1762_s6 + $0x18] sm:$0xff] %vm955_vm1, %v942_v24 }
 0x4eb   :  { %v943_v25 = vpop.trf.xlu0 }
 0x4ec   :  { %960 = vst.msk [vmem:[%s1762_s6 + $0x20] sm:$0xff] %vm955_vm1, %v943_v25 }
 0x4ef   :  { %v944_v20 = vpop.trf.xlu0 }
 0x4f0   :  { %961 = vst.msk [vmem:[%s1762_s6 + $0x28] sm:$0xff] %vm955_vm1, %v944_v20 }
 0x4f3   :  { %v945_v26 = vpop.trf.xlu0 }
 0x4f4   :  { %962 = vst.msk [vmem:[%s1762_s6 + $0x30] sm:$0xff] %vm955_vm1, %v945_v26 }
 0x4f7   :  { %v946_v29 = vpop.trf.xlu0 }
 0x4f8   :  { %963 = vst.msk [vmem:[%s1762_s6 + $0x38] sm:$0xff] %vm955_vm1, %v946_v29 }
 0x4fb   :  { %v947_v11 = vpop.trf.xlu0 }
 0x4fc   :  { %964 = vst.msk [vmem:[%s1762_s6 + $0x40] sm:$0xff] %vm955_vm1, %v947_v11 }
 0x4ff   :  { %v948_v30 = vpop.trf.xlu0 }
 0x500   :  { %965 = vst.msk [vmem:[%s1762_s6 + $0x48] sm:$0xff] %vm955_vm1, %v948_v30 }
 0x503   :  { %v949_v54 = vpop.trf.xlu0 }
 0x504   :  { %966 = vst.msk [vmem:[%s1762_s6 + $0x50] sm:$0xff] %vm955_vm1, %v949_v54 }
 0x507   :  { %v950_v32 = vpop.trf.xlu0 }
 0x508   :  { %967 = vst.msk [vmem:[%s1762_s6 + $0x58] sm:$0xff] %vm955_vm1, %v950_v32 }
 0x50b   :  { %v951_v3 = vpop.trf.xlu0 }
 0x50c   :  { %968 = vst.msk [vmem:[%s1762_s6 + $0x60] sm:$0xff] %vm955_vm1, %v951_v3 }
 0x50f   :  { %v952_v52 = vpop.trf.xlu0 }
 0x510   :  { %969 = vst.msk [vmem:[%s1762_s6 + $0x68] sm:$0xff] %vm955_vm1, %v952_v52 }
 0x513   :  { %v953_v34 = vpop.trf.xlu0 }
 0x514   :  { %970 = vst.msk [vmem:[%s1762_s6 + $0x70] sm:$0xff] %vm955_vm1, %v953_v34 }
 0x517   :  { %v954_v38 = vpop.trf.xlu0 }
 0x518   :  { %971 = vst.msk [vmem:[%s1762_s6 + $0x78] sm:$0xff] %vm955_vm1, %v954_v38 }

// kernel: tpu_custom_call.1
= control target key start
LH: loop header
LB: loop body
LE: loop exit
PB: predicated region body
PF: predicated region fallthrough
CT: control target
= control target key end

     0   :  { %vm81_vm0 = vcmask 261120   ;;  %v1308_v3 = vmov 0   ;;  %vm684_vm2 = vcmask 523264   ;;  %s1756_s0 = inlined_call_operand.vmem [shape: f32[128,32], index: 0, kind: input, shape index: {}]   ;;  %s1757_s1 = inlined_call_operand.vmem [shape: f32[32,32], index: 1, kind: input, shape index: {}]   ;;  %s1758_s5 = inlined_call_operand.vmem [shape: f32[144,1], index: 5, kind: input, shape index: {}]   ;;  %s1759_s2 = inlined_call_operand.vmem [shape: f32[64,32], index: 2, kind: input, shape index: {}]   ;;  %s1760_s3 = inlined_call_operand.vmem [shape: f32[32,64], index: 3, kind: input, shape index: {}]   ;;  %s1761_s4 = inlined_call_operand.vmem [shape: f32[16,32], index: 4, kind: input, shape index: {}]   ;;  %s1762_s6 = inlined_call_operand.vmem [shape: f32[128,16], index: 6, kind: output, shape index: {}]  }
   0x1   :  { %v41_v0 = vld [vmem:[%s1756_s0] sm:$0xff]  ;;  %v42_v1 = vld [vmem:[%s1756_s0 + $0x8] sm:$0xff]  ;;  %vm1353_vm1 = vmpackc.low %vm81_vm0, %vm81_vm0  ;;  %1234 = vset.pattern.permute.xlu0 %v1308_v3  ;;  %1235 = vset.pattern.permute.xlu1 %v1308_v3 }
   0x2   :  { %v1151_v4 = vpack.c.bf16 %v42_v1, %v41_v0  ;;  %v43_v5 = vld [vmem:[%s1756_s0 + $0x10] sm:$0xff]  ;;  %v44_v6 = vld [vmem:[%s1756_s0 + $0x18] sm:$0xff]  ;;  %v57_v8 = vld [vmem:[%s1757_s1] sm:$0xff] }
   0x3   :  { %v1157_v7 = vpack.c.bf16 %v44_v6, %v43_v5  ;;  %v45_v9 = vld [vmem:[%s1756_s0 + $0x20] sm:$0xff]  ;;  %v46_v10 = vld [vmem:[%s1756_s0 + $0x28] sm:$0xff]  ;;  %1092 = vmatprep.mubr.msk.f32.mxu0 %vm81_vm0, %v57_v8  ;;  %v25_v12 = vld [vmem:[%s1758_s5 + $0x10] sm:$0xff] }
   0x4   :  { %1153 = vmatprep.subr.msk.bf16.mxu0 %vm1353_vm1, %v1151_v4  ;;  %v23_v11 = vld [vmem:[%s1758_s5] sm:$0xff]  ;;  %73 = vperm.xlu1 %1235, %v25_v12   ;;  %v1163_v13 = vpack.c.bf16 %v46_v10, %v45_v9  ;;  %v24_v14 = vld [vmem:[%s1758_s5 + $0x8] sm:$0xff]  ;;  %v26_v15 = vld [vmem:[%s1758_s5 + $0x18] sm:$0xff] }
   0x5   :  { %1156 = vmatpush3.bf16.xpose.msk.msra.mxu0 %vm1353_vm1, %v1151_v4  ;;  %63 = vperm.xlu0 %1234, %v23_v11   ;;  %v27_v16 = vld [vmem:[%s1758_s5 + $0x20] sm:$0xff]  ;;  %v47_v17 = vld [vmem:[%s1756_s0 + $0x30] sm:$0xff]  ;;  %v48_v18 = vld [vmem:[%s1756_s0 + $0x38] sm:$0xff] }
   0x6   :  { %1159 = vmatprep.subr.msk.bf16.mxu0 %vm1353_vm1, %v1157_v7  ;;  %v28_v19 = vld [vmem:[%s1758_s5 + $0x28] sm:$0xff]  ;;  %v1169_v20 = vpack.c.bf16 %v48_v18, %v47_v17  ;;  %v29_v21 = vld [vmem:[%s1758_s5 + $0x30] sm:$0xff]  ;;  %v30_v22 = vld [vmem:[%s1758_s5 + $0x38] sm:$0xff] }
   0x7   :  { %v31_v23 = vld [vmem:[%s1758_s5 + $0x40] sm:$0xff]  ;;  %v50_v25 = vld [vmem:[%s1756_s0 + $0x48] sm:$0xff]  ;;  %v33_v28 = vld [vmem:[%s1758_s5 + $0x50] sm:$0xff] }
   0x8   :  { %78 = vperm.xlu1 %1235, %v26_v15   ;;  %v49_v24 = vld [vmem:[%s1756_s0 + $0x40] sm:$0xff]  ;;  %v32_v26 = vld [vmem:[%s1758_s5 + $0x48] sm:$0xff]  ;;  %v34_v29 = vld [vmem:[%s1758_s5 + $0x58] sm:$0xff] }
   0x9   :  { %68 = vperm.xlu0 %1234, %v24_v14   ;;  %v1175_v27 = vpack.c.bf16 %v50_v25, %v49_v24  ;;  %v35_v30 = vld [vmem:[%s1758_s5 + $0x60] sm:$0xff]  ;;  %v51_v31 = vld [vmem:[%s1756_s0 + $0x50] sm:$0xff]  ;;  %v52_v32 = vld [vmem:[%s1756_s0 + $0x58] sm:$0xff] }
   0xa   :  { %v36_v33 = vld [vmem:[%s1758_s5 + $0x68] sm:$0xff]  ;;  %v1181_v34 = vpack.c.bf16 %v52_v32, %v51_v31  ;;  %v37_v35 = vld [vmem:[%s1758_s5 + $0x70] sm:$0xff]  ;;  %v38_v36 = vld [vmem:[%s1758_s5 + $0x78] sm:$0xff] }
   0xb   :  { %v39_v37 = vld [vmem:[%s1758_s5 + $0x80] sm:$0xff]  ;;  %v54_v39 = vld [vmem:[%s1756_s0 + $0x68] sm:$0xff]  ;;  %v55_v42 = vld [vmem:[%s1756_s0 + $0x70] sm:$0xff] }
   0xc   :  { %266 = vperm.xlu1 %1235, %v28_v19   ;;  %v53_v38 = vld [vmem:[%s1756_s0 + $0x60] sm:$0xff]  ;;  %v40_v40 = vld [vmem:[%s1758_s5 + $0x88] sm:$0xff]  ;;  %v56_v43 = vld [vmem:[%s1756_s0 + $0x78] sm:$0xff] }
   0xd   :  { %1162 = vmatpush3.bf16.xpose.msk.msra.mxu0 %vm1353_vm1, %v1157_v7  ;;  %261 = vperm.xlu0 %1234, %v27_v16   ;;  %v1187_v41 = vpack.c.bf16 %v54_v39, %v53_v38  ;;  %v1193_v44 = vpack.c.bf16 %v56_v43, %v55_v42  ;;  %v58_v45 = vld [vmem:[%s1757_s1 + $0x8] sm:$0xff]  ;;  %v59_v46 = vld [vmem:[%s1757_s1 + $0x10] sm:$0xff]  ;;  %v60_v47 = vld [vmem:[%s1757_s1 + $0x18] sm:$0xff] }
   0xe   :  { %1165 = vmatprep.subr.msk.bf16.mxu0 %vm1353_vm1, %v1163_v13  ;;  %v251_v48 = vld [vmem:[%s1759_s2] sm:$0xff]  ;;  %v252_v19 = vld [vmem:[%s1759_s2 + $0x8] sm:$0xff]  ;;  %v257_v24 = vld [vmem:[%s1759_s2 + $0x30] sm:$0xff] }
   0xf   :  { %1106 = vmatprep.mubr.msk.f32.mxu1 %vm81_vm0, %v251_v48  ;;  %v258_v25 = vld [vmem:[%s1759_s2 + $0x38] sm:$0xff] }
  0x10   :  { %276 = vperm.xlu1 %1235, %v30_v22   ;;  %v255_v22 = vld [vmem:[%s1759_s2 + $0x20] sm:$0xff] }
  0x11   :  { %271 = vperm.xlu0 %1234, %v29_v21   ;;  %v254_v21 = vld [vmem:[%s1759_s2 + $0x18] sm:$0xff] }
  0x14   :  { %286 = vperm.xlu1 %1235, %v32_v26   ;;  %v660_v26 = vld [vmem:[%s1760_s3] sm:$0xff] }
  0x15   :  { %1168 = vmatpush3.bf16.xpose.msk.msra.mxu0 %vm1353_vm1, %v1163_v13  ;;  %281 = vperm.xlu0 %1234, %v31_v23   ;;  %v256_v23 = vld [vmem:[%s1759_s2 + $0x28] sm:$0xff] }
  0x16   :  { %1171 = vmatprep.subr.msk.bf16.mxu0 %vm1353_vm1, %v1169_v20 }
  0x18   :  { %296 = vperm.xlu1 %1235, %v34_v29  }
  0x19   :  { %291 = vperm.xlu0 %1234, %v33_v28  }
  0x1c   :  { %671 = vperm.xlu1 %1235, %v36_v33  }
  0x1d   :  { %1174 = vmatpush3.bf16.xpose.msk.msra.mxu0 %vm1353_vm1, %v1169_v20  ;;  %666 = vperm.xlu0 %1234, %v35_v30   ;;  %v253_v20 = vld [vmem:[%s1759_s2 + $0x10] sm:$0xff] }
  0x1e   :  { %1177 = vmatprep.subr.msk.bf16.mxu0 %vm1353_vm1, %v1175_v27 }
  0x20   :  { %681 = vperm.xlu1 %1235, %v38_v36  }
  0x21   :  { %676 = vperm.xlu0 %1234, %v37_v35  }
  0x24   :  { %823 = vperm.xlu1 %1235, %v40_v40  }
  0x25   :  { %1180 = vmatpush3.bf16.xpose.msk.msra.mxu0 %vm1353_vm1, %v1175_v27  ;;  %818 = vperm.xlu0 %1234, %v39_v37  }
  0x26   :  { %1183 = vmatprep.subr.msk.bf16.mxu0 %vm1353_vm1, %v1181_v34 }
  0x2d   :  { %1186 = vmatpush3.bf16.xpose.msk.msra.mxu0 %vm1353_vm1, %v1181_v34 }
  0x2e   :  { %1189 = vmatprep.subr.msk.bf16.mxu0 %vm1353_vm1, %v1187_v41 }
  0x35   :  { %1192 = vmatpush3.bf16.xpose.msk.msra.mxu0 %vm1353_vm1, %v1187_v41 }
  0x36   :  { %1195 = vmatprep.subr.msk.bf16.mxu0 %vm1353_vm1, %v1193_v44 }
  0x3d   :  { %1198 = vmatpush3.bf16.xpose.msk.msra.mxu0 %vm1353_vm1, %v1193_v44  ;;  %vm955_vm1 = vcmask 130048  }
  0x44   :  { %1093 = vmatmul.mubr.msk.f32.vlgmr.msra.gmra.mrb[0].mxu0 %vm81_vm0, %v58_v45 }
  0x45   :  { %1095 = vmatprep.mubr.msk.f32.mxu0 %vm81_vm0, %v59_v46 }
  0x48   :  { %1096 = vmatmul.mubr.msk.f32.gmra.mrb[2].mxu0 %vm81_vm0, %v60_v47 }
  0x83   :  { %v74_v50 = vpop.permute.xlu1 %73 }
  0x84   :  { %v64_v49 = vpop.permute.xlu0 %63 }
  0x87   :  { %v79_v57 = vpop.permute.xlu1 %78 }
  0x88   :  { %v69_v51 = vpop.permute.xlu0 %68 }
  0x8b   :  { %v267_v27 = vpop.permute.xlu1 %266 }
  0x8c   :  { %v262_v28 = vpop.permute.xlu0 %261 }
  0x8f   :  { %v277_v34 = vpop.permute.xlu1 %276 }
  0x90   :  { %v272_v37 = vpop.permute.xlu0 %271 }
 0x117   :  { %v1094_v52 = vpop.f32.mrb[0].mxu0 }
 0x118   :  { %v214_v53 = vadd.f32 %v1094_v52, %v69_v51  ;;  %v208_v54 = vpop.f32.mrb[1].mxu0  ;;  %v287_v52 = vpop.permute.xlu1 %286 }
 0x119   :  { %v209_v55 = vadd.f32 %v208_v54, %v64_v49 }
 0x11a   :  { %v228_v56 = vsub.f32 0.0, %v214_v53 }
 0x11b   :  { %v227_v58 = vsub.f32 0.0, %v209_v55  ;;  %v1097_v59 = vpop.f32.mrb[2].mxu0  ;;  %v282_v55 = vpop.permute.xlu0 %281 }
 0x11c   :  { %v233_v60 = vmul.f32 1.442695, %v228_v56  ;;  %v224_v61 = vadd.f32 %v1097_v59, %v79_v57  ;;  %v218_v62 = vpop.f32.mrb[3].mxu0 }
 0x11d   :  { %v231_v63 = vmul.f32 1.442695, %v227_v58  ;;  %v219_v0 = vadd.f32 %v218_v62, %v74_v50 }
 0x11e   :  { %1236 = vpow2.f32 %v233_v60  ;;  %v230_v1 = vsub.f32 0.0, %v224_v61 }
 0x11f   :  { %1238 = vpow2.f32 %v231_v63  ;;  %v229_v2 = vsub.f32 0.0, %v219_v0 }
 0x120   :  { %v237_v3 = vmul.f32 1.442695, %v230_v1 }
 0x121   :  { %v235_v4 = vmul.f32 1.442695, %v229_v2 }
 0x122   :  { %1240 = vpow2.f32 %v237_v3 }
 0x123   :  { %1242 = vpow2.f32 %v235_v4 }
 0x128   :  { %v1237_v5 = vpop.eup %1236 }
 0x129   :  { %v1239_v6 = vpop.eup %1238  ;;  %v240_v7 = vadd.f32 1.0, %v1237_v5 }
 0x12a   :  { %v239_v8 = vadd.f32 1.0, %v1239_v6 }
 0x12b   :  { %1244 = vrcp.f32 %v240_v7  ;;  %v1309_v7 = vmov -1.0  }
 0x12c   :  { %v1241_v9 = vpop.eup %1240  ;;  %1246 = vrcp.f32 %v239_v8 }
 0x12d   :  { %v1243_v10 = vpop.eup %1242  ;;  %v242_v11 = vadd.f32 1.0, %v1241_v9 }
 0x12e   :  { %v241_v12 = vadd.f32 1.0, %v1243_v10 }
 0x12f   :  { %1248 = vrcp.f32 %v242_v11 }
 0x130   :  { %1250 = vrcp.f32 %v241_v12  ;;  %v297_v12 = vpop.permute.xlu1 %296 }
 0x135   :  { %v1245_v13 = vpop.eup %1244 }
 0x136   :  { %v1247_v14 = vpop.eup %1246 }
 0x137   :  { %v1199_v15 = vpack.c.bf16 %v1245_v13, %v1247_v14 }
 0x139   :  { %v1249_v16 = vpop.eup %1248  ;;  %1200 = vmatprep.subr.bf16.mxu1 %v1199_v15 }
 0x13a   :  { %v1251_v17 = vpop.eup %1250  ;;  %1202 = vmatpush3.bf16.msra.mxu1 %v1199_v15 }
 0x13b   :  { %v1203_v18 = vpack.c.bf16 %v1249_v16, %v1251_v17 }
 0x13d   :  { %1204 = vmatprep.subr.bf16.mxu1 %v1203_v18 }
 0x13e   :  { %1206 = vmatpush3.bf16.msra.mxu1 %v1203_v18 }
 0x141   :  { %1107 = vmatmul.mubr.msk.f32.vlgmr.msra.gmra.mrb[0].mxu1 %vm81_vm0, %v252_v19 }
 0x142   :  { %1109 = vmatprep.mubr.msk.f32.mxu1 %vm81_vm0, %v253_v20 }
 0x145   :  { %1110 = vmatmul.mubr.msk.f32.gmra.mrb[2].mxu1 %vm81_vm0, %v254_v21  ;;  %v292_v21 = vpop.permute.xlu0 %291 }
 0x146   :  { %1112 = vmatprep.mubr.msk.f32.mxu1 %vm81_vm0, %v255_v22 }
 0x149   :  { %1113 = vmatmul.mubr.msk.f32.gmra.mrb[4].mxu1 %vm81_vm0, %v256_v23 }
 0x14a   :  { %1115 = vmatprep.mubr.msk.f32.mxu1 %vm81_vm0, %v257_v24 }
 0x14d   :  { %1116 = vmatmul.mubr.msk.f32.gmra.mrb[6].mxu1 %vm81_vm0, %v258_v25 }
 0x14e   :  { %1134 = vmatprep.mubr.msk.f32.mxu1 %vm684_vm2, %v660_v26 }
 0x214   :  { %v1108_v29 = vpop.f32.mrb[0].mxu1 }
 0x215   :  { %v395_v30 = vadd.f32 %v1108_v29, %v267_v27  ;;  %v389_v31 = vpop.f32.mrb[1].mxu1 }
 0x216   :  { %v390_v32 = vadd.f32 %v389_v31, %v262_v28 }
 0x217   :  { %v437_v33 = vmul.f32 0.70710677, %v395_v30  ;;  %v1553_v3 = vmul.f32 0.5, %v395_v30 }
 0x218   :  { %v436_v35 = vmul.f32 0.70710677, %v390_v32  ;;  %v1111_v36 = vpop.f32.mrb[2].mxu1  ;;  %v1559_v9 = vmul.f32 0.5, %v390_v32 }
 0x219   :  { %v461_v38 = vand.u32 2147483647, %v437_v33  ;;  %v405_v39 = vadd.f32 %v1111_v36, %v277_v34  ;;  %v399_v40 = vpop.f32.mrb[3].mxu1  ;;  %vm445_vm3 = vcmp.ge.f32.partialorder %v437_v33, 0.0 }
 0x21a   :  { %v460_v41 = vand.u32 2147483647, %v436_v35  ;;  %v1537_v42 = vadd.f32 %v399_v40, %v272_v37  ;;  %vm444_vm4 = vcmp.ge.f32.partialorder %v436_v35, 0.0  ;;  %v1557_v8 = vsel %vm445_vm3, 1.0, %v1309_v7 }
 0x21b   :  { %v469_v43 = vmul.f32 0.3275911, %v461_v38  ;;  %v439_v45 = vmul.f32 0.70710677, %v405_v39  ;;  %v589_v56 = vsub.f32 0.0, %v461_v38  ;;  %v1563_v13 = vsel %vm444_vm4, 1.0, %v1309_v7 }
 0x21c   :  { %v468_v44 = vmul.f32 0.3275911, %v460_v41  ;;  %v1540_v47 = vmul.f32 0.70710677, %v1537_v42  ;;  %v1114_v48 = vpop.f32.mrb[4].mxu1  ;;  %v588_v62 = vsub.f32 0.0, %v460_v41 }
 0x21d   :  { %v477_v46 = vadd.f32 1.0, %v469_v43  ;;  %v463_v50 = vand.u32 2147483647, %v439_v45  ;;  %v409_v51 = vpop.f32.mrb[5].mxu1  ;;  %v1543_v58 = vadd.f32 %v1114_v48, %v287_v52  ;;  %v597_v4 = vmul.f32 %v589_v56, %v461_v38 }
 0x21e   :  { %v476_v49 = vadd.f32 1.0, %v468_v44  ;;  %v462_v57 = vand.u32 2147483647, %v1540_v47  ;;  %v1545_v61 = vadd.f32 %v409_v51, %v282_v55  ;;  %v596_v14 = vmul.f32 %v588_v62, %v460_v41 }
 0x21f   :  { %1252 = vrcp.f32 %v477_v46  ;;  %v471_v53 = vmul.f32 0.3275911, %v463_v50  ;;  %v1548_v0 = vmul.f32 0.70710677, %v1543_v58  ;;  %v591_v1 = vsub.f32 0.0, %v463_v50 }
 0x220   :  { %1254 = vrcp.f32 %v476_v49  ;;  %v1117_v54 = vpop.f32.mrb[6].mxu1  ;;  %v470_v63 = vmul.f32 0.3275911, %v462_v57  ;;  %v1551_v2 = vmul.f32 0.70710677, %v1545_v61  ;;  %v590_v10 = vsub.f32 0.0, %v462_v57 }
 0x221   :  { %v419_v59 = vpop.f32.mrb[7].mxu1  ;;  %v479_v60 = vadd.f32 1.0, %v471_v53  ;;  %v465_v6 = vand.u32 2147483647, %v1548_v0  ;;  %v1565_v16 = vmul.f32 0.5, %v405_v39  ;;  %v599_v17 = vmul.f32 %v591_v1, %v463_v50 }
 0x222   :  { %v478_v5 = vadd.f32 1.0, %v470_v63  ;;  %v464_v11 = vand.u32 2147483647, %v1551_v2  ;;  %v1567_v19 = vadd.f32 %v1117_v54, %v297_v12  ;;  %v606_v22 = vmul.f32 1.442695, %v597_v4 }
 0x223   :  { %1256 = vrcp.f32 %v479_v60  ;;  %v473_v15 = vmul.f32 0.3275911, %v465_v6  ;;  %vm447_vm5 = vcmp.ge.f32.partialorder %v439_v45, 0.0  ;;  %vm446_vm6 = vcmp.ge.f32.partialorder %v1540_v47, 0.0 }
 0x224   :  { %1258 = vrcp.f32 %v478_v5  ;;  %v472_v18 = vmul.f32 0.3275911, %v464_v11  ;;  %v598_v26 = vmul.f32 %v590_v10, %v462_v57  ;;  %v1570_v28 = vadd.f32 %v419_v59, %v292_v21 }
 0x225   :  { %v481_v23 = vadd.f32 1.0, %v473_v15  ;;  %v604_v30 = vmul.f32 1.442695, %v596_v14  ;;  %v1573_v31 = vmul.f32 0.70710677, %v1567_v19  ;;  %v1576_v33 = vsel %vm447_vm5, 1.0, %v1309_v7 }
 0x226   :  { %v480_v27 = vadd.f32 1.0, %v472_v18  ;;  %v610_v34 = vmul.f32 1.442695, %v599_v17  ;;  %v593_v36 = vsub.f32 0.0, %v465_v6  ;;  %v1584_v40 = vsel %vm446_vm6, 1.0, %v1309_v7 }
 0x227   :  { %1260 = vrcp.f32 %v481_v23  ;;  %v467_v37 = vand.u32 2147483647, %v1573_v31  ;;  %v608_v41 = vmul.f32 1.442695, %v598_v26  ;;  %v1587_v43 = vmul.f32 0.70710677, %v1570_v28 }
 0x228   :  { %1262 = vrcp.f32 %v480_v27  ;;  %v601_v53 = vmul.f32 %v593_v36, %v465_v6  ;;  %vm449_vm7 = vcmp.ge.f32.partialorder %v1548_v0, 0.0  ;;  %vm448_vm8 = vcmp.ge.f32.partialorder %v1551_v2, 0.0 }
 0x229   :  { %v1253_v20 = vpop.eup %1252  ;;  %1264 = vpow2.f32 %v606_v22  ;;  %v466_v50 = vand.u32 2147483647, %v1587_v43  ;;  %v456_v2 = vsel %vm448_vm8, 1.0, %v1309_v7  ;;  %vm451_vm9 = vcmp.ge.f32.partialorder %v1573_v31, 0.0 }
 0x22a   :  { %v1255_v24 = vpop.eup %1254  ;;  %v493_v25 = vmul.f32 %v1253_v20, %v477_v46  ;;  %1266 = vpow2.f32 %v604_v30  ;;  %v475_v46 = vmul.f32 0.3275911, %v467_v37  ;;  %v614_v15 = vmul.f32 1.442695, %v601_v53 }
 0x22b   :  { %v492_v29 = vmul.f32 %v1255_v24, %v476_v49  ;;  %1268 = vpow2.f32 %v610_v34  ;;  %v592_v49 = vsub.f32 0.0, %v464_v11  ;;  %v474_v57 = vmul.f32 0.3275911, %v466_v50 }
 0x22c   :  { %v501_v32 = vsub.f32 2.0, %v493_v25  ;;  %v483_v54 = vadd.f32 1.0, %v475_v46  ;;  %1270 = vpow2.f32 %v608_v41  ;;  %v594_v17 = vsub.f32 0.0, %v466_v50 }
 0x22d   :  { %v500_v35 = vsub.f32 2.0, %v492_v29  ;;  %v1257_v38 = vpop.eup %1256  ;;  %v600_v4 = vmul.f32 %v592_v49, %v464_v11  ;;  %v482_v10 = vadd.f32 1.0, %v474_v57  ;;  %vm450_vm10 = vcmp.ge.f32.partialorder %v1587_v43, 0.0  ;;  %v661_v43 = vld [vmem:[%s1760_s3 + $0x8] sm:$0xff] }
 0x22e   :  { %v1579_v39 = vmul.f32 %v1253_v20, %v501_v32  ;;  %v495_v45 = vmul.f32 %v1257_v38, %v479_v60  ;;  %v1259_v51 = vpop.eup %1258  ;;  %1272 = vrcp.f32 %v483_v54  ;;  %v595_v60 = vsub.f32 0.0, %v467_v37 }
 0x22f   :  { %v1589_v44 = vmul.f32 %v1255_v24, %v500_v35  ;;  %v494_v56 = vmul.f32 %v1259_v51, %v478_v5  ;;  %1274 = vrcp.f32 %v482_v10  ;;  %v612_v34 = vmul.f32 1.442695, %v600_v4 }
 0x230   :  { %v517_v48 = vmul.f32 1.0614054, %v1579_v39  ;;  %v503_v52 = vsub.f32 2.0, %v495_v45  ;;  %v603_v29 = vmul.f32 %v595_v60, %v467_v37  ;;  %v602_v45 = vmul.f32 %v594_v17, %v466_v50 }
 0x231   :  { %v516_v47 = vmul.f32 1.0614054, %v1589_v44  ;;  %v502_v1 = vsub.f32 2.0, %v494_v56  ;;  %v1261_v12 = vpop.eup %1260  ;;  %1276 = vpow2.f32 %v614_v15  ;;  %v458_v31 = vsel %vm450_vm10, 1.0, %v1309_v7 }
 0x232   :  { %v525_v55 = vadd.f32 -1.4531521, %v517_v48  ;;  %v1594_v62 = vmul.f32 %v1257_v38, %v503_v52  ;;  %v1263_v5 = vpop.eup %1262  ;;  %v497_v21 = vmul.f32 %v1261_v12, %v481_v23  ;;  %1278 = vpow2.f32 %v612_v34 }
 0x233   :  { %v524_v59 = vadd.f32 -1.4531521, %v516_v47  ;;  %v1599_v20 = vmul.f32 %v1259_v51, %v502_v1  ;;  %v1265_v22 = vpop.eup %1264  ;;  %v496_v26 = vmul.f32 %v1263_v5, %v480_v27  ;;  %v618_v47 = vmul.f32 1.442695, %v603_v29 }
 0x234   :  { %v533_v63 = vmul.f32 %v525_v55, %v1579_v39  ;;  %v519_v6 = vmul.f32 1.0614054, %v1594_v62  ;;  %v505_v32 = vsub.f32 2.0, %v497_v21  ;;  %v1267_v35 = vpop.eup %1266 }
 0x235   :  { %v532_v14 = vmul.f32 %v524_v59, %v1589_v44  ;;  %v518_v30 = vmul.f32 1.0614054, %v1599_v20  ;;  %v504_v41 = vsub.f32 2.0, %v496_v26  ;;  %v1269_v23 = vpop.eup %1268  ;;  %1280 = vpow2.f32 %v618_v47 }
 0x236   :  { %v541_v18 = vadd.f32 1.4214138, %v533_v63  ;;  %v527_v25 = vadd.f32 -1.4531521, %v519_v6  ;;  %v1605_v49 = vmul.f32 %v1261_v12, %v505_v32  ;;  %v1609_v52 = vpop.eup %1270  ;;  %v1617_v63 = vmul.f32 1.442695, %v602_v45 }
 0x237   :  { %v540_v24 = vadd.f32 1.4214138, %v532_v14  ;;  %v526_v48 = vadd.f32 -1.4531521, %v518_v30  ;;  %v1607_v51 = vmul.f32 %v1263_v5, %v504_v41 }
 0x238   :  { %v549_v11 = vmul.f32 %v541_v18, %v1579_v39  ;;  %v535_v38 = vmul.f32 %v527_v25, %v1594_v62  ;;  %v521_v56 = vmul.f32 1.0614054, %v1605_v49  ;;  %v1273_v50 = vpop.eup %1272  ;;  %1282 = vpow2.f32 %v1617_v63 }
 0x239   :  { %v548_v36 = vmul.f32 %v540_v24, %v1589_v44  ;;  %v534_v55 = vmul.f32 %v526_v48, %v1599_v20  ;;  %v520_v60 = vmul.f32 1.0614054, %v1607_v51  ;;  %v499_v14 = vmul.f32 %v1273_v50, %v483_v54  ;;  %v1275_v5 = vpop.eup %1274 }
 0x23a   :  { %v557_v46 = vadd.f32 -0.28449672, %v549_v11  ;;  %v543_v37 = vadd.f32 1.4214138, %v535_v38  ;;  %v529_v12 = vadd.f32 -1.4531521, %v521_v56  ;;  %v498_v30 = vmul.f32 %v1275_v5, %v482_v10 }
 0x23b   :  { %v556_v27 = vadd.f32 -0.28449672, %v548_v36  ;;  %v542_v4 = vadd.f32 1.4214138, %v534_v55  ;;  %v528_v17 = vadd.f32 -1.4531521, %v520_v60 }
 0x23c   :  { %v565_v53 = vmul.f32 %v557_v46, %v1579_v39  ;;  %v551_v59 = vmul.f32 %v543_v37, %v1594_v62  ;;  %v537_v24 = vmul.f32 %v529_v12, %v1605_v49  ;;  %v507_v25 = vsub.f32 2.0, %v499_v14  ;;  %v1277_v46 = vpop.eup %1276 }
 0x23d   :  { %v564_v57 = vmul.f32 %v556_v27, %v1589_v44  ;;  %v550_v21 = vmul.f32 %v542_v4, %v1599_v20  ;;  %v536_v11 = vmul.f32 %v528_v17, %v1607_v51  ;;  %v506_v45 = vsub.f32 2.0, %v498_v30  ;;  %v1279_v55 = vpop.eup %1278 }
 0x23e   :  { %v573_v1 = vadd.f32 0.2548296, %v565_v53  ;;  %v559_v15 = vadd.f32 -0.28449672, %v551_v59  ;;  %v545_v34 = vadd.f32 1.4214138, %v537_v24  ;;  %v1625_v36 = vmul.f32 %v1273_v50, %v507_v25 }
 0x23f   :  { %v572_v6 = vadd.f32 0.2548296, %v564_v57  ;;  %v558_v32 = vadd.f32 -0.28449672, %v550_v21  ;;  %v1632_v53 = vmul.f32 %v1275_v5, %v506_v45 }
 0x240   :  { %v581_v18 = vmul.f32 %v573_v1, %v1579_v39  ;;  %v567_v29 = vmul.f32 %v559_v15, %v1594_v62  ;;  %v544_v39 = vadd.f32 1.4214138, %v536_v11  ;;  %v523_v37 = vmul.f32 1.0614054, %v1625_v36  ;;  %v1281_v15 = vpop.eup %1280 }
 0x241   :  { %v580_v26 = vmul.f32 %v572_v6, %v1589_v44  ;;  %v566_v27 = vmul.f32 %v558_v32, %v1599_v20  ;;  %v553_v44 = vmul.f32 %v545_v34, %v1605_v49  ;;  %v522_v4 = vmul.f32 1.0614054, %v1632_v53 }
 0x242   :  { %v621_v54 = vmul.f32 %v1265_v22, %v581_v18  ;;  %v575_v41 = vadd.f32 0.2548296, %v567_v29  ;;  %v552_v22 = vmul.f32 %v544_v39, %v1607_v51  ;;  %v531_v57 = vadd.f32 -1.4531521, %v523_v37 }
 0x243   :  { %v620_v38 = vmul.f32 %v1267_v35, %v580_v26  ;;  %v574_v56 = vadd.f32 0.2548296, %v566_v27  ;;  %v561_v50 = vadd.f32 -0.28449672, %v553_v44  ;;  %v530_v18 = vadd.f32 -1.4531521, %v522_v4  ;;  %v1283_v4 = vpop.eup %1282 }
 0x244   :  { %v629_v48 = vsub.f32 1.0, %v621_v54  ;;  %v583_v10 = vmul.f32 %v575_v41, %v1594_v62  ;;  %v560_v1 = vadd.f32 -0.28449672, %v552_v22  ;;  %v539_v6 = vmul.f32 %v531_v57, %v1625_v36 }
 0x245   :  { %v628_v47 = vsub.f32 1.0, %v620_v38  ;;  %v582_v14 = vmul.f32 %v574_v56, %v1599_v20  ;;  %v569_v62 = vmul.f32 %v561_v50, %v1605_v49  ;;  %v538_v29 = vmul.f32 %v530_v18, %v1632_v53 }
 0x246   :  { %v637_v35 = vmul.f32 %v629_v48, %v1557_v8  ;;  %v623_v60 = vmul.f32 %v1269_v23, %v583_v10  ;;  %v568_v8 = vmul.f32 %v560_v1, %v1607_v51  ;;  %v547_v24 = vadd.f32 1.4214138, %v539_v6 }
 0x247   :  { %v636_v59 = vmul.f32 %v628_v47, %v1563_v13  ;;  %v622_v13 = vmul.f32 %v1609_v52, %v582_v14  ;;  %v577_v23 = vadd.f32 0.2548296, %v569_v62  ;;  %v546_v52 = vadd.f32 1.4214138, %v538_v29 }
 0x248   :  { %v645_v12 = vadd.f32 1.0, %v637_v35  ;;  %v631_v5 = vsub.f32 1.0, %v623_v60  ;;  %v576_v26 = vadd.f32 0.2548296, %v568_v8  ;;  %v555_v54 = vmul.f32 %v547_v24, %v1625_v36 }
 0x249   :  { %v644_v17 = vadd.f32 1.0, %v636_v59  ;;  %v630_v11 = vsub.f32 1.0, %v622_v13  ;;  %v585_v30 = vmul.f32 %v577_v23, %v1605_v49  ;;  %v554_v49 = vmul.f32 %v546_v52, %v1632_v53  ;;  %v672_v13 = vpop.permute.xlu1 %671  ;;  %v667_v23 = vpop.permute.xlu0 %666 }
 0x24a   :  { %v653_v21 = vmul.f32 %v645_v12, %v1553_v3  ;;  %v639_v20 = vmul.f32 %v631_v5, %v1576_v33  ;;  %v584_v3 = vmul.f32 %v576_v26, %v1607_v51  ;;  %v563_v41 = vadd.f32 -0.28449672, %v555_v54 }
 0x24b   :  { %v652_v25 = vmul.f32 %v644_v17, %v1559_v9  ;;  %v638_v38 = vmul.f32 %v630_v11, %v1584_v40  ;;  %v625_v9 = vmul.f32 %v1277_v46, %v585_v30  ;;  %v430_v33 = vmul.f32 0.5, %v1537_v42 }
 0x24c   :  { %v647_v32 = vadd.f32 1.0, %v639_v20  ;;  %v624_v39 = vmul.f32 %v1279_v55, %v584_v3  ;;  %v571_v27 = vmul.f32 %v563_v41, %v1625_v36  ;;  %v457_v40 = vsel %vm449_vm7, 1.0, %v1309_v7 }
 0x24d   :  { %v1207_v34 = vpack.c.bf16 %v653_v21, %v652_v25  ;;  %v646_v48 = vadd.f32 1.0, %v638_v38  ;;  %v633_v51 = vsub.f32 1.0, %v625_v9  ;;  %v562_v46 = vadd.f32 -0.28449672, %v554_v49  ;;  %v682_v11 = vpop.permute.xlu1 %681 }
 0x24e   :  { %v655_v45 = vmul.f32 %v647_v32, %v1565_v16  ;;  %v632_v63 = vsub.f32 1.0, %v624_v39  ;;  %v579_v37 = vadd.f32 0.2548296, %v571_v27  ;;  %v433_v16 = vmul.f32 0.5, %v1543_v58  ;;  %v677_v32 = vpop.permute.xlu0 %676 }
 0x24f   :  { %1208 = vmatprep.subr.bf16.mxu1 %v1207_v34  ;;  %v654_v42 = vmul.f32 %v646_v48, %v430_v33  ;;  %v641_v44 = vmul.f32 %v633_v51, %v457_v40  ;;  %v570_v10 = vmul.f32 %v562_v46, %v1632_v53  ;;  %v432_v56 = vmul.f32 0.5, %v1545_v61 }
 0x250   :  { %1210 = vmatpush3.bf16.msra.mxu1 %v1207_v34  ;;  %v640_v47 = vmul.f32 %v632_v63, %v456_v2  ;;  %v587_v55 = vmul.f32 %v579_v37, %v1625_v36  ;;  %v459_v58 = vsel %vm451_vm9, 1.0, %v1309_v7  ;;  %v434_v5 = vmul.f32 0.5, %v1570_v28  ;;  %v662_v7 = vld [vmem:[%s1760_s3 + $0x10] sm:$0xff]  ;;  %v814_v28 = vld [vmem:[%s1761_s4] sm:$0xff] }
 0x251   :  { %v649_v22 = vadd.f32 1.0, %v641_v44  ;;  %v1211_v35 = vpack.c.bf16 %v655_v45, %v654_v42  ;;  %v578_v50 = vadd.f32 0.2548296, %v570_v10 }
 0x252   :  { %v648_v0 = vadd.f32 1.0, %v640_v47  ;;  %v627_v59 = vmul.f32 %v1281_v15, %v587_v55  ;;  %v435_v15 = vmul.f32 0.5, %v1567_v19  ;;  %v663_v19 = vld [vmem:[%s1760_s3 + $0x18] sm:$0xff] }
 0x253   :  { %v657_v57 = vmul.f32 %v649_v22, %v433_v16  ;;  %1212 = vmatprep.subr.bf16.mxu1 %v1211_v35  ;;  %v586_v1 = vmul.f32 %v578_v50, %v1632_v53 }
 0x254   :  { %v656_v60 = vmul.f32 %v648_v0, %v432_v56  ;;  %1214 = vmatpush3.bf16.msra.mxu1 %v1211_v35  ;;  %v635_v12 = vsub.f32 1.0, %v627_v59 }
 0x255   :  { %v626_v36 = vmul.f32 %v1283_v4, %v586_v1  ;;  %v824_v1 = vpop.permute.xlu1 %823 }
 0x256   :  { %v1215_v14 = vpack.c.bf16 %v657_v57, %v656_v60  ;;  %v643_v61 = vmul.f32 %v635_v12, %v459_v58  ;;  %v815_v60 = vld [vmem:[%s1761_s4 + $0x8] sm:$0xff]  ;;  %v819_v12 = vpop.permute.xlu0 %818 }
 0x257   :  { %v634_v62 = vsub.f32 1.0, %v626_v36 }
 0x258   :  { %1216 = vmatprep.subr.bf16.mxu1 %v1215_v14  ;;  %v651_v6 = vadd.f32 1.0, %v643_v61 }
 0x259   :  { %1218 = vmatpush3.bf16.msra.mxu1 %v1215_v14  ;;  %v642_v17 = vmul.f32 %v634_v62, %v458_v31 }
 0x25a   :  { %v659_v53 = vmul.f32 %v651_v6, %v435_v15 }
 0x25b   :  { %v650_v8 = vadd.f32 1.0, %v642_v17 }
 0x25d   :  { %v658_v18 = vmul.f32 %v650_v8, %v434_v5 }
 0x25f   :  { %v1219_v21 = vpack.c.bf16 %v659_v53, %v658_v18 }
 0x261   :  { %1220 = vmatprep.subr.bf16.mxu1 %v1219_v21 }
 0x262   :  { %1222 = vmatpush3.bf16.msra.mxu1 %v1219_v21 }
 0x265   :  { %1135 = vmatmul.mubr.msk.f32.vlgmr.msra.gmra.mrb[8].mxu1 %vm684_vm2, %v661_v43 }
 0x266   :  { %1137 = vmatprep.mubr.msk.f32.mxu1 %vm684_vm2, %v662_v7 }
 0x269   :  { %1138 = vmatmul.mubr.msk.f32.gmra.mrb[10].mxu1 %vm684_vm2, %v663_v19 }
 0x26a   :  { %1148 = vmatprep.mubr.msk.f32.mxu1 %vm81_vm0, %v814_v28 }
 0x338   :  { %v1136_v24 = vpop.f32.mrb[8].mxu1 }
 0x339   :  { %v769_v25 = vadd.f32 %v1136_v24, %v672_v13  ;;  %v763_v20 = vpop.f32.mrb[9].mxu1 }
 0x33a   :  { %v764_v26 = vadd.f32 %v763_v20, %v667_v23 }
 0x33b   :  { %v787_v29 = vmin.f32 %v769_v25, 20.0  ;;  %vm783_vm11 = vcmp.gt.f32.partialorder %v769_v25, 20.0 }
 0x33c   :  { %v786_v30 = vmin.f32 %v764_v26, 20.0  ;;  %v1139_v54 = vpop.f32.mrb[10].mxu1  ;;  %vm782_vm12 = vcmp.gt.f32.partialorder %v764_v26, 20.0 }
 0x33d   :  { %v792_v3 = vmul.f32 1.442695, %v787_v29  ;;  %v779_v52 = vadd.f32 %v1139_v54, %v682_v11  ;;  %v773_v34 = vpop.f32.mrb[11].mxu1 }
 0x33e   :  { %v790_v38 = vmul.f32 1.442695, %v786_v30  ;;  %v774_v9 = vadd.f32 %v773_v34, %v677_v32 }
 0x33f   :  { %1284 = vpow2.f32 %v792_v3  ;;  %v789_v41 = vmin.f32 %v779_v52, 20.0  ;;  %vm785_vm13 = vcmp.gt.f32.partialorder %v779_v52, 20.0 }
 0x340   :  { %1286 = vpow2.f32 %v790_v38  ;;  %v788_v33 = vmin.f32 %v774_v9, 20.0  ;;  %vm784_vm14 = vcmp.gt.f32.partialorder %v774_v9, 20.0 }
 0x341   :  { %v796_v39 = vmul.f32 1.442695, %v789_v41 }
 0x342   :  { %v794_v49 = vmul.f32 1.442695, %v788_v33 }
 0x343   :  { %1288 = vpow2.f32 %v796_v39 }
 0x344   :  { %1290 = vpow2.f32 %v794_v49 }
 0x349   :  { %v1285_v45 = vpop.eup %1284 }
 0x34a   :  { %v1287_v48 = vpop.eup %1286  ;;  %v799_v51 = vadd.f32 1.0, %v1285_v45 }
 0x34b   :  { %v798_v27 = vadd.f32 1.0, %v1287_v48 }
 0x34c   :  { %1292 = vlog2.f32 %v799_v51 }
 0x34d   :  { %v1289_v40 = vpop.eup %1288  ;;  %1294 = vlog2.f32 %v798_v27 }
 0x34e   :  { %v1291_v63 = vpop.eup %1290  ;;  %v801_v46 = vadd.f32 1.0, %v1289_v40 }
 0x34f   :  { %v800_v42 = vadd.f32 1.0, %v1291_v63 }
 0x350   :  { %1296 = vlog2.f32 %v801_v46 }
 0x351   :  { %1298 = vlog2.f32 %v800_v42 }
 0x356   :  { %v1293_v44 = vpop.eup %1292 }
 0x357   :  { %v1295_v2 = vpop.eup %1294  ;;  %v805_v37 = vmul.f32 0.6931472, %v1293_v44 }
 0x358   :  { %v803_v47 = vmul.f32 0.6931472, %v1295_v2 }
 0x359   :  { %v811_v10 = vsel %vm783_vm11, %v769_v25, %v805_v37 }
 0x35a   :  { %v1297_v16 = vpop.eup %1296  ;;  %v810_v22 = vsel %vm782_vm12, %v764_v26, %v803_v47 }
 0x35b   :  { %v1299_v55 = vpop.eup %1298  ;;  %v1223_v35 = vpack.c.bf16 %v811_v10, %v810_v22  ;;  %v809_v56 = vmul.f32 0.6931472, %v1297_v16 }
 0x35c   :  { %v807_v0 = vmul.f32 0.6931472, %v1299_v55 }
 0x35d   :  { %1224 = vmatprep.subr.bf16.mxu1 %v1223_v35  ;;  %v813_v50 = vsel %vm785_vm13, %v779_v52, %v809_v56 }
 0x35e   :  { %1226 = vmatpush3.bf16.msra.mxu1 %v1223_v35  ;;  %v812_v57 = vsel %vm784_vm14, %v774_v9, %v807_v0 }
 0x35f   :  { %v1227_v59 = vpack.c.bf16 %v813_v50, %v812_v57 }
 0x361   :  { %1228 = vmatprep.subr.bf16.mxu1 %v1227_v59 }
 0x362   :  { %1230 = vmatpush3.bf16.msra.mxu1 %v1227_v59 }
 0x365   :  { %1149 = vmatmul.mubr.msk.f32.vlgmr.msra.gmra.mrb[12].mxu1 %vm81_vm0, %v815_v60 }
 0x438   :  { %v1150_v4 = vpop.f32.mrb[12].mxu1 }
 0x439   :  { %v904_v58 = vadd.f32 %v1150_v4, %v824_v1  ;;  %v898_v36 = vpop.f32.mrb[13].mxu1 }
 0x43a   :  { %v899_v14 = vadd.f32 %v898_v36, %v819_v12 }
 0x43b   :  { %v910_v61 = vmin.f32 %v904_v58, 20.0  ;;  %vm908_vm0 = vcmp.gt.f32.partialorder %v904_v58, 20.0 }
 0x43c   :  { %v909_v62 = vmin.f32 %v899_v14, 20.0  ;;  %vm907_vm15 = vcmp.gt.f32.partialorder %v899_v14, 20.0 }
 0x43d   :  { %v913_v6 = vmul.f32 1.442695, %v910_v61 }
 0x43e   :  { %v911_v31 = vmul.f32 1.442695, %v909_v62 }
 0x43f   :  { %1300 = vpow2.f32 %v913_v6 }
 0x440   :  { %1302 = vpow2.f32 %v911_v31 }
 0x449   :  { %v1301_v15 = vpop.eup %1300 }
 0x44a   :  { %v1303_v17 = vpop.eup %1302  ;;  %v916_v53 = vadd.f32 1.0, %v1301_v15 }
 0x44b   :  { %v915_v5 = vadd.f32 1.0, %v1303_v17 }
 0x44c   :  { %1304 = vlog2.f32 %v916_v53 }
 0x44d   :  { %1306 = vlog2.f32 %v915_v5 }
 0x456   :  { %v1305_v8 = vpop.eup %1304 }
 0x457   :  { %v1307_v18 = vpop.eup %1306  ;;  %v920_v7 = vmul.f32 0.6931472, %v1305_v8 }
 0x458   :  { %v918_v21 = vmul.f32 0.6931472, %v1307_v18 }
 0x459   :  { %v922_v19 = vsel %vm908_vm0, %v904_v58, %v920_v7 }
 0x45a   :  { %v921_v43 = vsel %vm907_vm15, %v899_v14, %v918_v21 }
 0x45b   :  { %923 = vxpose.xlu0.b32.start [1/2] (short) %v921_v43, 128 }
 0x45f   :  { %924 = vxpose.xlu0.b32.end [2/2] (short) %v922_v19, 128 }
 0x4db   :  { %v939_v28 = vpop.trf.xlu0 }
 0x4dc   :  { %956 = vst.msk [vmem:[%s1762_s6] sm:$0xff] %vm955_vm1, %v939_v28 }
 0x4df   :  { %v940_v13 = vpop.trf.xlu0 }
 0x4e0   :  { %957 = vst.msk [vmem:[%s1762_s6 + $0x8] sm:$0xff] %vm955_vm1, %v940_v13 }
 0x4e3   :  { %v941_v23 = vpop.trf.xlu0 }
 0x4e4   :  { %958 = vst.msk [vmem:[%s1762_s6 + $0x10] sm:$0xff] %vm955_vm1, %v941_v23 }
 0x4e7   :  { %v942_v24 = vpop.trf.xlu0 }
 0x4e8   :  { %959 = vst.msk [vmem:[%s1762_s6 + $0x18] sm:$0xff] %vm955_vm1, %v942_v24 }
 0x4eb   :  { %v943_v25 = vpop.trf.xlu0 }
 0x4ec   :  { %960 = vst.msk [vmem:[%s1762_s6 + $0x20] sm:$0xff] %vm955_vm1, %v943_v25 }
 0x4ef   :  { %v944_v20 = vpop.trf.xlu0 }
 0x4f0   :  { %961 = vst.msk [vmem:[%s1762_s6 + $0x28] sm:$0xff] %vm955_vm1, %v944_v20 }
 0x4f3   :  { %v945_v26 = vpop.trf.xlu0 }
 0x4f4   :  { %962 = vst.msk [vmem:[%s1762_s6 + $0x30] sm:$0xff] %vm955_vm1, %v945_v26 }
 0x4f7   :  { %v946_v29 = vpop.trf.xlu0 }
 0x4f8   :  { %963 = vst.msk [vmem:[%s1762_s6 + $0x38] sm:$0xff] %vm955_vm1, %v946_v29 }
 0x4fb   :  { %v947_v11 = vpop.trf.xlu0 }
 0x4fc   :  { %964 = vst.msk [vmem:[%s1762_s6 + $0x40] sm:$0xff] %vm955_vm1, %v947_v11 }
 0x4ff   :  { %v948_v30 = vpop.trf.xlu0 }
 0x500   :  { %965 = vst.msk [vmem:[%s1762_s6 + $0x48] sm:$0xff] %vm955_vm1, %v948_v30 }
 0x503   :  { %v949_v54 = vpop.trf.xlu0 }
 0x504   :  { %966 = vst.msk [vmem:[%s1762_s6 + $0x50] sm:$0xff] %vm955_vm1, %v949_v54 }
 0x507   :  { %v950_v32 = vpop.trf.xlu0 }
 0x508   :  { %967 = vst.msk [vmem:[%s1762_s6 + $0x58] sm:$0xff] %vm955_vm1, %v950_v32 }
 0x50b   :  { %v951_v3 = vpop.trf.xlu0 }
 0x50c   :  { %968 = vst.msk [vmem:[%s1762_s6 + $0x60] sm:$0xff] %vm955_vm1, %v951_v3 }
 0x50f   :  { %v952_v52 = vpop.trf.xlu0 }
 0x510   :  { %969 = vst.msk [vmem:[%s1762_s6 + $0x68] sm:$0xff] %vm955_vm1, %v952_v52 }
 0x513   :  { %v953_v34 = vpop.trf.xlu0 }
 0x514   :  { %970 = vst.msk [vmem:[%s1762_s6 + $0x70] sm:$0xff] %vm955_vm1, %v953_v34 }
 0x517   :  { %v954_v38 = vpop.trf.xlu0 }
 0x518   :  { %971 = vst.msk [vmem:[%s1762_s6 + $0x78] sm:$0xff] %vm955_vm1, %v954_v38 }

</bundles_post_ra>
